<compile_context>
chip_gen: v5e
topology: v5e:2x2
jax: 0.10.0
libtpu: 0.0.40
codegen_flags: <defaults>
</compile_context>

<pallas_src>
import numpy as np
import jax
import jax.numpy as jnp
from jax.experimental import pallas as pl
from jax.experimental.pallas import tpu as pltpu

# ---------------- configuration (small shapes consistent with the module) ----------------
NUM_KPTS = 8
NUM_TPTS = 3                      # CNN_GCN_C hard-codes self.num_tpts = 3
KPT_CHANNELS = 2                  # required so the final reshape [..., 2] is valid
GCN_CHANNELS = (16, 32)           # gcn_channels
NUM_NODES = NUM_KPTS * NUM_TPTS   # 24
FEATURE_SIZE = 64                 # image_encoder.img_feature_size (synthetic stand-in)
ENC_CH = 16                       # synthetic encoder hidden channels

B, C_IN, T_IN, H_IN, W_IN = 2, 3, 4, 16, 16
P = T_IN * H_IN * W_IN            # 1024 spatial positions -> lane dimension

C1, C2 = GCN_CHANNELS             # 16, 32
KC2 = NUM_KPTS * C2               # 256
KC1 = NUM_KPTS * C1               # 128
KKC = NUM_KPTS * KPT_CHANNELS     # 16
ROWS = NUM_TPTS * B               # 6 decoder rows, ordered (t, b)

# ---- bf16 weight-slab layout (one DMA); sub-blocks at (16,128)-aligned offsets ----
BQ_SHAPE = (2 * KC2, 2 * KC2)     # (512, 512) bf16
#   w0r : rows 0:NUM_TPTS*FEATURE_SIZE , cols 0:KC2
#   w2f : rows 0:KC2                   , cols KC2:KC2+2*KC1
#   w1f : rows KC2:2*KC2               , cols 0:2*KC2

# ---- f32 small-parameter slab layout (one DMA); 8-aligned row bands, width KC2 ----
B0_R = 0        # rows 0:ROWS  cols 0:KC2          layer-0 bias tiled to (t, b) rows
BT1_R = 8       # cols 0:KC2
BT2_R = 16      # cols 0:KC1
BT3_R = 24      # cols 0:KKC
BF_R = 32       # cols 0:FEATURE_SIZE
WC_R = 40       # rows 40:40+B*ENC_CH  cols 0:B*C_IN  block-diag channel mix (+bc col)
WFT_R = 72      # rows 72:72+ENC_CH    cols 0:FEATURE_SIZE
W3_R = 88       # rows 88:88+KC1       cols 0:2*KKC   final spiral layer (kept f32)
FP_ROWS = W3_R + KC1              # 216


def build_spiral_indices(num_kpts, num_tpts):
    """Exact transcription of spatiotemporal_kpts_decoder.__init__ index construction."""
    adjacency = []
    for ii in range(num_kpts):
        row = list(range(num_kpts))
        row.insert(0, row.pop(ii))
        adjacency.append(row)
    adjacency = np.array(adjacency, dtype=np.int32)                 # (K, K)
    indices = adjacency
    for tpts in range(1, num_tpts):
        indices = np.concatenate([indices, adjacency + num_kpts * tpts], axis=0)
    time_edges = np.roll(indices[:, 0], num_kpts)
    indices = np.concatenate([indices, time_edges[:, None]], axis=1)
    if num_tpts > 3:
        time_edges = np.roll(indices[:, 0], -num_kpts)
        indices = np.concatenate([indices, time_edges[:, None]], axis=1)
    return indices                                                  # (num_kpts*num_tpts, S)


SPIRAL_IDX = build_spiral_indices(NUM_KPTS, NUM_TPTS)               # (24, 9)
SEQ_LEN = SPIRAL_IDX.shape[1]


# ---------------- Pallas kernel: encoder + full keypoint decoder (single invocation) ----------------
def cnn_gcn_kernel(x_ref, wq_ref, wp_ref, out_ref):
    f32, bf16 = jnp.float32, jnp.bfloat16
    K, T, F, E = NUM_KPTS, NUM_TPTS, FEATURE_SIZE, ENC_CH

    # --- synthetic image encoder: block-diagonal channel mix over BOTH batch items in one
    #     MXU dot (lane-dense P = 1024), ReLU, global average pool, FC, ReLU ---
    wcb = wp_ref[WC_R:WC_R + B * E, 0:B * C_IN]                      # (B*E, B*C) block-diag
    bc = wp_ref[WC_R:WC_R + B * E, B * C_IN:B * C_IN + 1]            # (B*E, 1)
    z = jnp.maximum(jnp.dot(wcb, x_ref[...], preferred_element_type=f32) + bc, 0.0)
    m = jnp.mean(z, axis=1, keepdims=True)                           # (B*E, 1) GAP
    pooled = jnp.concatenate([m[b * E:(b + 1) * E, :] for b in range(B)], axis=1).T  # (B, E)
    feat = jnp.maximum(
        jnp.dot(pooled, wp_ref[WFT_R:WFT_R + E, 0:F], preferred_element_type=f32)
        + wp_ref[BF_R:BF_R + 1, 0:F], 0.0)                           # (B, F)

    # --- decoder layer 0: Linear(F -> N*C2) restructured into (t, b) rows of width K*C2.
    #     bf16 LHS + bf16 weights -> native MXU bf16-in / f32-accumulate path. ---
    featq = feat.astype(bf16)
    h = jnp.concatenate(
        [jnp.dot(featq, wq_ref[t * F:(t + 1) * F, 0:KC2], preferred_element_type=f32)
         for t in range(T)], axis=0) + wp_ref[0:ROWS, 0:KC2]         # (ROWS, KC2)

    def elu(v):
        return jnp.where(v > 0.0, v, jnp.exp(jnp.minimum(v, 0.0)) - 1.0)

    tshift = (NUM_TPTS - 1) * B    # previous-time-slice row roll amount

    def spiral(h_rows, w_fused, bias, kcout):
        # One fused matmul: columns = [spatial spiral fold | block-diag temporal weight].
        # The static spiral gather is pre-folded into w_fused; the time edge is applied as
        # a single row roll of the temporal half of the RESULT (roll(h)@W == roll(h@W)).
        u = jnp.dot(h_rows.astype(w_fused.dtype), w_fused, preferred_element_type=f32)
        spat, tpart = u[:, :kcout], u[:, kcout:]
        temp = jnp.concatenate([tpart[tshift:, :], tpart[:tshift, :]], axis=0)
        return spat + temp + bias

    h = elu(spiral(h, wq_ref[KC2:2 * KC2, 0:2 * KC2],
                   wp_ref[BT1_R:BT1_R + 1, 0:KC2], KC2))             # SpiralConv 32 -> 32
    h = elu(spiral(h, wq_ref[0:KC2, KC2:KC2 + 2 * KC1],
                   wp_ref[BT2_R:BT2_R + 1, 0:KC1], KC1))             # SpiralConv 32 -> 16
    out_ref[...] = spiral(h, wp_ref[W3_R:W3_R + KC1, 0:2 * KKC],
                          wp_ref[BT3_R:BT3_R + 1, 0:KKC], KKC)       # SpiralConv 16 -> 2 (f32)


# ---------------- parameter setup (plain numpy / JAX glue) ----------------
def init_raw_params(key):
    def uinit(k, shape, fan_in):
        bound = 1.0 / np.sqrt(fan_in)
        return jax.random.uniform(k, shape, jnp.float32, -bound, bound)

    def bf16_round(a):
        # large weights are stored in bf16 by the kernel; round once here so that the
        # reference and the kernel use bit-identical weight values.
        return a.astype(jnp.bfloat16).astype(jnp.float32)

    ks = jax.random.split(key, 12)
    s = SEQ_LEN
    return dict(
        wc=uinit(ks[0], (ENC_CH, C_IN), C_IN),            bc=uinit(ks[1], (ENC_CH,), C_IN),
        wf=uinit(ks[2], (FEATURE_SIZE, ENC_CH), ENC_CH),  bf=uinit(ks[3], (FEATURE_SIZE,), ENC_CH),
        w0=bf16_round(uinit(ks[4], (NUM_NODES * C2, FEATURE_SIZE), FEATURE_SIZE)),
        b0=uinit(ks[5], (NUM_NODES * C2,), FEATURE_SIZE),
        w1=bf16_round(uinit(ks[6], (C2, s * C2), s * C2)), b1=uinit(ks[7], (C2,), s * C2),
        w2=bf16_round(uinit(ks[8], (C1, s * C2), s * C2)), b2=uinit(ks[9], (C1,), s * C2),
        w3=uinit(ks[10], (KPT_CHANNELS, s * C1), s * C1),
        b3=uinit(ks[11], (KPT_CHANNELS,), s * C1),
    )


def prepare_kernel_params(raw):
    """Fold the static spiral gather per time slice + block-diag temporal weight, and pack
    everything into two slabs (one bf16, one f32) so the kernel needs only 3 input DMAs."""
    K, T, S = NUM_KPTS, NUM_TPTS, SEQ_LEN
    idx = np.asarray(SPIRAL_IDX)

    # structural facts the folding relies on (hold by construction for num_tpts == 3)
    assert S == K + 1
    for n in range(NUM_NODES):
        t = n // K
        assert np.array_equal(idx[n, :K], idx[n % K, :K] + t * K)
        assert idx[n, K] == (n - K) % NUM_NODES
    for k in range(K):
        assert sorted(idx[k, :K].tolist()) == list(range(K))

    def fold_spatial(w, cin, cout):
        w = np.asarray(w, np.float32)                        # (cout, S*cin)
        out = np.zeros((K * cin, K * cout), np.float32)      # shared by every time slice
        for k in range(K):
            for s in range(K):
                m = int(idx[k, s])
                out[m * cin:(m + 1) * cin, k * cout:(k + 1) * cout] = \
                    w[:, s * cin:(s + 1) * cin].T
        return out

    def temporal_blockdiag(w, cin, cout):
        wt = np.asarray(w, np.float32)[:, K * cin:(K + 1) * cin].T   # (cin, cout)
        out = np.zeros((K * cin, K * cout), np.float32)
        for k in range(K):
            out[k * cin:(k + 1) * cin, k * cout:(k + 1) * cout] = wt
        return out

    def fused(w, cin, cout):
        return np.concatenate([fold_spatial(w, cin, cout),
                               temporal_blockdiag(w, cin, cout)], axis=1)

    w1f = fused(raw['w1'], C2, C2)                 # (256, 512)
    w2f = fused(raw['w2'], C2, C1)                 # (256, 256)
    w3f = fused(raw['w3'], C1, KPT_CHANNELS)       # (128, 32) -- stays f32

    # layer-0 weight regrouped per time slice: h_rows(t,b) = feat(b) @ w0r[t*F:(t+1)*F]
    w0t = np.asarray(raw['w0'], np.float32).T      # (F, N*C2)
    w0r = np.concatenate([w0t[:, t * KC2:(t + 1) * KC2] for t in range(T)], axis=0)

    # --- bf16 weight slab (values already bf16-representable -> lossless cast) ---
    wq = np.zeros(BQ_SHAPE, np.float32)
    wq[0:T * FEATURE_SIZE, 0:KC2] = w0r
    wq[0:KC2, KC2:KC2 + 2 * KC1] = w2f
    wq[KC2:2 * KC2, 0:2 * KC2] = w1f

    # --- f32 small-parameter slab ---
    wp = np.zeros((FP_ROWS, KC2), np.float32)
    b0 = np.asarray(raw['b0'], np.float32)
    for t in range(T):
        for b in range(B):
            wp[t * B + b, 0:KC2] = b0[t * KC2:(t + 1) * KC2]
    wp[BT1_R, 0:KC2] = np.tile(np.asarray(raw['b1'], np.float32), K)
    wp[BT2_R, 0:KC1] = np.tile(np.asarray(raw['b2'], np.float32), K)
    wp[BT3_R, 0:KKC] = np.tile(np.asarray(raw['b3'], np.float32), K)
    wp[BF_R, 0:FEATURE_SIZE] = np.asarray(raw['bf'], np.float32)
    wc = np.asarray(raw['wc'], np.float32)
    bc = np.asarray(raw['bc'], np.float32)
    for b in range(B):
        wp[WC_R + b * ENC_CH:WC_R + (b + 1) * ENC_CH, b * C_IN:(b + 1) * C_IN] = wc
        wp[WC_R + b * ENC_CH:WC_R + (b + 1) * ENC_CH, B * C_IN] = bc
    wp[WFT_R:WFT_R + ENC_CH, 0:FEATURE_SIZE] = np.asarray(raw['wf'], np.float32).T
    wp[W3_R:W3_R + KC1, 0:2 * KKC] = w3f

    return jnp.asarray(wq, jnp.bfloat16), jnp.asarray(wp, jnp.float32)


# ---------------- wrapper ----------------
def cnn_gcn_forward(x_ncdhw, kernel_params):
    wq, wp = kernel_params
    assert x_ncdhw.shape == (B, C_IN, T_IN, H_IN, W_IN)
    # NCDHW -> (B*C, P): a free reshape; keeps P = T*H*W = 1024 in the lane dimension.
    x2 = x_ncdhw.reshape(B * C_IN, P)

    flops = (2 * (B * ENC_CH) * (B * C_IN) * P          # encoder channel mix
             + 2 * B * ENC_CH * FEATURE_SIZE            # encoder FC
             + 2 * B * FEATURE_SIZE * NUM_NODES * C2)   # decoder layer 0
    for cin, cout in ((C2, C2), (C2, C1), (C1, KPT_CHANNELS)):
        flops += 2 * ROWS * (NUM_KPTS * cin) * (2 * NUM_KPTS * cout)   # fused spiral matmul
    bytes_accessed = int(x2.size * x2.dtype.itemsize + wq.size * wq.dtype.itemsize
                         + wp.size * wp.dtype.itemsize + ROWS * KKC * 4)

    vmem = pl.BlockSpec(memory_space=pltpu.MemorySpace.VMEM)
    out_rows = pl.pallas_call(
        cnn_gcn_kernel,
        out_shape=jax.ShapeDtypeStruct((ROWS, KKC), jnp.float32),
        in_specs=[vmem, vmem, vmem],
        out_specs=vmem,
        cost_estimate=pl.CostEstimate(flops=flops,
                                      transcendentals=ROWS * (KC2 + KC1),
                                      bytes_accessed=bytes_accessed),
    )(x2, wq, wp)
    # rows are ordered (t, b); module returns kpts_flatten.reshape([B, num_tpts, num_kpts, 2])
    return out_rows.reshape(NUM_TPTS, B, NUM_KPTS, KPT_CHANNELS).transpose(1, 0, 2, 3)


# ---------------- pure-JAX reference (explicit gather) for verification ----------------
def reference_forward(x_ncdhw, raw):
    hi = jax.lax.Precision.HIGHEST
    b = x_ncdhw.shape[0]

    def bq(a):   # mirror the kernel's bf16 MXU inputs (weights are already bf16-rounded)
        return a.astype(jnp.bfloat16).astype(jnp.float32)

    x = jnp.transpose(x_ncdhw, (0, 2, 3, 4, 1)).reshape(b, -1, x_ncdhw.shape[1])
    z = jax.nn.relu(jnp.einsum('bpc,ec->bpe', x, raw['wc'], precision=hi) + raw['bc'])
    pooled = jnp.mean(z, axis=1)
    feat = jax.nn.relu(jnp.dot(pooled, raw['wf'].T, precision=hi) + raw['bf'])
    h = jnp.dot(bq(feat), raw['w0'].T, precision=hi) + raw['b0']
    h = h.reshape(b, NUM_NODES, C2)
    idx = jnp.asarray(SPIRAL_IDX).reshape(-1)

    def spiral(hh, w, bb, quant):
        hin = bq(hh) if quant else hh
        g = jnp.take(hin, idx, axis=1).reshape(b, NUM_NODES, -1)
        return jnp.einsum('bnk,ok->bno', g, w, precision=hi) + bb

    h = jax.nn.elu(spiral(h, raw['w1'], raw['b1'], True))
    h = jax.nn.elu(spiral(h, raw['w2'], raw['b2'], True))
    h = spiral(h, raw['w3'], raw['b3'], False)
    return h.reshape(b, NUM_TPTS, NUM_KPTS, KPT_CHANNELS)


if __name__ == "__main__":
    key = jax.random.PRNGKey(0)
    k_x, k_p = jax.random.split(key)
    x = jax.random.normal(k_x, (B, C_IN, T_IN, H_IN, W_IN), dtype=jnp.float32)

    raw = init_raw_params(k_p)
    kernel_params = prepare_kernel_params(raw)

    out = jax.block_until_ready(cnn_gcn_forward(x, kernel_params))
    ref = jax.block_until_ready(reference_forward(x, raw))

    assert out.shape == (B, NUM_TPTS, NUM_KPTS, KPT_CHANNELS), out.shape
    if not np.allclose(np.asarray(out), np.asarray(ref), rtol=2e-3, atol=2e-3):
        raise AssertionError(
            f"Pallas kernel mismatch vs reference: max abs diff = "
            f"{np.max(np.abs(np.asarray(out) - np.asarray(ref)))}")
    print("KERNEL_OK")
</pallas_src>

<mosaic_0001>
module attributes {stable_mosaic.version = 11 : i64} {
  func.func @cnn_gcn_kernel(%arg0: memref<6x1024xf32, #tpu.memory_space<vmem>>, %arg1: memref<512x512xbf16, #tpu.memory_space<vmem>>, %arg2: memref<216x256xf32, #tpu.memory_space<vmem>>, %arg3: memref<6x16xf32, #tpu.memory_space<vmem>>) attributes {dimension_semantics = [], scalar_prefetch = 0 : i64, scratch_operands = 0 : i64, tpu.core_type = #tpu.core_type<tc>} {
    %c40 = arith.constant 40 : index
    %c0 = arith.constant 0 : index
    %0 = vector.load %arg2[%c40, %c0] : memref<216x256xf32, #tpu.memory_space<vmem>>, vector<32x6xf32>
    %c40_0 = arith.constant 40 : index
    %c6 = arith.constant 6 : index
    %1 = vector.load %arg2[%c40_0, %c6] : memref<216x256xf32, #tpu.memory_space<vmem>>, vector<32x1xf32>
    %c0_1 = arith.constant 0 : index
    %c0_2 = arith.constant 0 : index
    %2 = vector.load %arg0[%c0_1, %c0_2] : memref<6x1024xf32, #tpu.memory_space<vmem>>, vector<6x1024xf32>
    %cst = arith.constant dense<0.000000e+00> : vector<32x1024xf32>
    %3 = tpu.matmul %0, %2, %cst {dimension_numbers = #tpu.dot_dimension_numbers<[1], [0], [0], [1], [0, 0, 1, 1], [], []>} : vector<32x6xf32>, vector<6x1024xf32>, vector<32x1024xf32> -> vector<32x1024xf32>
    %4 = vector.broadcast %1 : vector<32x1xf32> to vector<32x1024xf32>
    %5 = arith.addf %3, %4 : vector<32x1024xf32>
    %cst_3 = arith.constant 0.000000e+00 : f32
    %6 = vector.broadcast %cst_3 : f32 to vector<32x1024xf32>
    %7 = arith.maximumf %5, %6 : vector<32x1024xf32>
    %cst_4 = arith.constant dense<0.000000e+00> : vector<32xf32>
    %8 = vector.multi_reduction <add>, %7, %cst_4 [1] : vector<32x1024xf32> to vector<32xf32>
    %9 = vector.shape_cast %8 : vector<32xf32> to vector<32x1xf32>
    %cst_5 = arith.constant 1.024000e+03 : f32
    %10 = vector.broadcast %cst_5 : f32 to vector<32x1xf32>
    %11 = arith.divf %9, %10 : vector<32x1xf32>
    %12 = vector.extract_strided_slice %11 {offsets = [0, 0], sizes = [16, 1], strides = [1, 1]} : vector<32x1xf32> to vector<16x1xf32>
    %13 = vector.extract_strided_slice %11 {offsets = [16, 0], sizes = [16, 1], strides = [1, 1]} : vector<32x1xf32> to vector<16x1xf32>
    %14 = tpu.concatenate %12, %13 in 1 : vector<16x1xf32>, vector<16x1xf32> -> vector<16x2xf32>
    %15 = tpu.transpose %14, [1, 0] : vector<16x2xf32> -> vector<2x16xf32>
    %c72 = arith.constant 72 : index
    %c0_6 = arith.constant 0 : index
    %16 = vector.load %arg2[%c72, %c0_6] : memref<216x256xf32, #tpu.memory_space<vmem>>, vector<16x64xf32>
    %cst_7 = arith.constant dense<0.000000e+00> : vector<2x64xf32>
    %17 = tpu.matmul %15, %16, %cst_7 {dimension_numbers = #tpu.dot_dimension_numbers<[1], [0], [0], [1], [0, 0, 1, 1], [], []>} : vector<2x16xf32>, vector<16x64xf32>, vector<2x64xf32> -> vector<2x64xf32>
    %c32 = arith.constant 32 : index
    %c0_8 = arith.constant 0 : index
    %18 = vector.load %arg2[%c32, %c0_8] : memref<216x256xf32, #tpu.memory_space<vmem>>, vector<1x64xf32>
    %19 = vector.broadcast %18 : vector<1x64xf32> to vector<2x64xf32>
    %20 = arith.addf %17, %19 : vector<2x64xf32>
    %cst_9 = arith.constant 0.000000e+00 : f32
    %21 = vector.broadcast %cst_9 : f32 to vector<2x64xf32>
    %22 = arith.maximumf %20, %21 : vector<2x64xf32>
    %23 = arith.truncf %22 : vector<2x64xf32> to vector<2x64xbf16>
    %c0_10 = arith.constant 0 : index
    %c0_11 = arith.constant 0 : index
    %24 = vector.load %arg1[%c0_10, %c0_11] : memref<512x512xbf16, #tpu.memory_space<vmem>>, vector<64x256xbf16>
    %cst_12 = arith.constant dense<0.000000e+00> : vector<2x256xf32>
    %25 = tpu.matmul %23, %24, %cst_12 {dimension_numbers = #tpu.dot_dimension_numbers<[1], [0], [0], [1], [0, 0, 1, 1], [], []>} : vector<2x64xbf16>, vector<64x256xbf16>, vector<2x256xf32> -> vector<2x256xf32>
    %c64 = arith.constant 64 : index
    %c0_13 = arith.constant 0 : index
    %26 = vector.load %arg1[%c64, %c0_13] : memref<512x512xbf16, #tpu.memory_space<vmem>>, vector<64x256xbf16>
    %cst_14 = arith.constant dense<0.000000e+00> : vector<2x256xf32>
    %27 = tpu.matmul %23, %26, %cst_14 {dimension_numbers = #tpu.dot_dimension_numbers<[1], [0], [0], [1], [0, 0, 1, 1], [], []>} : vector<2x64xbf16>, vector<64x256xbf16>, vector<2x256xf32> -> vector<2x256xf32>
    %c128 = arith.constant 128 : index
    %c0_15 = arith.constant 0 : index
    %28 = vector.load %arg1[%c128, %c0_15] : memref<512x512xbf16, #tpu.memory_space<vmem>>, vector<64x256xbf16>
    %cst_16 = arith.constant dense<0.000000e+00> : vector<2x256xf32>
    %29 = tpu.matmul %23, %28, %cst_16 {dimension_numbers = #tpu.dot_dimension_numbers<[1], [0], [0], [1], [0, 0, 1, 1], [], []>} : vector<2x64xbf16>, vector<64x256xbf16>, vector<2x256xf32> -> vector<2x256xf32>
    %30 = tpu.concatenate %25, %27, %29 in 0 : vector<2x256xf32>, vector<2x256xf32>, vector<2x256xf32> -> vector<6x256xf32>
    %c0_17 = arith.constant 0 : index
    %c0_18 = arith.constant 0 : index
    %31 = vector.load %arg2[%c0_17, %c0_18] : memref<216x256xf32, #tpu.memory_space<vmem>>, vector<6x256xf32>
    %32 = arith.addf %30, %31 : vector<6x256xf32>
    %c256 = arith.constant 256 : index
    %c0_19 = arith.constant 0 : index
    %33 = vector.load %arg1[%c256, %c0_19] : memref<512x512xbf16, #tpu.memory_space<vmem>>, vector<256x512xbf16>
    %c8 = arith.constant 8 : index
    %c0_20 = arith.constant 0 : index
    %34 = vector.load %arg2[%c8, %c0_20] : memref<216x256xf32, #tpu.memory_space<vmem>>, vector<1x256xf32>
    %35 = arith.truncf %32 : vector<6x256xf32> to vector<6x256xbf16>
    %cst_21 = arith.constant dense<0.000000e+00> : vector<6x512xf32>
    %36 = tpu.matmul %35, %33, %cst_21 {dimension_numbers = #tpu.dot_dimension_numbers<[1], [0], [0], [1], [0, 0, 1, 1], [], []>} : vector<6x256xbf16>, vector<256x512xbf16>, vector<6x512xf32> -> vector<6x512xf32>
    %37 = vector.extract_strided_slice %36 {offsets = [0, 0], sizes = [6, 256], strides = [1, 1]} : vector<6x512xf32> to vector<6x256xf32>
    %38 = vector.extract_strided_slice %36 {offsets = [0, 256], sizes = [6, 256], strides = [1, 1]} : vector<6x512xf32> to vector<6x256xf32>
    %39 = vector.extract_strided_slice %38 {offsets = [4, 0], sizes = [2, 256], strides = [1, 1]} : vector<6x256xf32> to vector<2x256xf32>
    %40 = vector.extract_strided_slice %38 {offsets = [0, 0], sizes = [4, 256], strides = [1, 1]} : vector<6x256xf32> to vector<4x256xf32>
    %41 = tpu.concatenate %39, %40 in 0 : vector<2x256xf32>, vector<4x256xf32> -> vector<6x256xf32>
    %42 = arith.addf %37, %41 : vector<6x256xf32>
    %43 = vector.broadcast %34 : vector<1x256xf32> to vector<6x256xf32>
    %44 = arith.addf %42, %43 : vector<6x256xf32>
    %cst_22 = arith.constant 0.000000e+00 : f32
    %45 = vector.broadcast %cst_22 : f32 to vector<6x256xf32>
    %46 = arith.cmpf ogt, %44, %45 : vector<6x256xf32>
    %cst_23 = arith.constant 0.000000e+00 : f32
    %47 = vector.broadcast %cst_23 : f32 to vector<6x256xf32>
    %48 = arith.minimumf %44, %47 : vector<6x256xf32>
    %49 = math.exp %48 : vector<6x256xf32>
    %cst_24 = arith.constant 1.000000e+00 : f32
    %50 = vector.broadcast %cst_24 : f32 to vector<6x256xf32>
    %51 = arith.subf %49, %50 : vector<6x256xf32>
    %52 = arith.select %46, %44, %51 : vector<6x256xi1>, vector<6x256xf32>
    %c0_25 = arith.constant 0 : index
    %c256_26 = arith.constant 256 : index
    %53 = vector.load %arg1[%c0_25, %c256_26] : memref<512x512xbf16, #tpu.memory_space<vmem>>, vector<256x256xbf16>
    %c16 = arith.constant 16 : index
    %c0_27 = arith.constant 0 : index
    %54 = vector.load %arg2[%c16, %c0_27] : memref<216x256xf32, #tpu.memory_space<vmem>>, vector<1x128xf32>
    %55 = arith.truncf %52 : vector<6x256xf32> to vector<6x256xbf16>
    %cst_28 = arith.constant dense<0.000000e+00> : vector<6x256xf32>
    %56 = tpu.matmul %55, %53, %cst_28 {dimension_numbers = #tpu.dot_dimension_numbers<[1], [0], [0], [1], [0, 0, 1, 1], [], []>} : vector<6x256xbf16>, vector<256x256xbf16>, vector<6x256xf32> -> vector<6x256xf32>
    %57 = vector.extract_strided_slice %56 {offsets = [0, 0], sizes = [6, 128], strides = [1, 1]} : vector<6x256xf32> to vector<6x128xf32>
    %58 = vector.extract_strided_slice %56 {offsets = [0, 128], sizes = [6, 128], strides = [1, 1]} : vector<6x256xf32> to vector<6x128xf32>
    %59 = vector.extract_strided_slice %58 {offsets = [4, 0], sizes = [2, 128], strides = [1, 1]} : vector<6x128xf32> to vector<2x128xf32>
    %60 = vector.extract_strided_slice %58 {offsets = [0, 0], sizes = [4, 128], strides = [1, 1]} : vector<6x128xf32> to vector<4x128xf32>
    %61 = tpu.concatenate %59, %60 in 0 : vector<2x128xf32>, vector<4x128xf32> -> vector<6x128xf32>
    %62 = arith.addf %57, %61 : vector<6x128xf32>
    %63 = vector.broadcast %54 : vector<1x128xf32> to vector<6x128xf32>
    %64 = arith.addf %62, %63 : vector<6x128xf32>
    %cst_29 = arith.constant 0.000000e+00 : f32
    %65 = vector.broadcast %cst_29 : f32 to vector<6x128xf32>
    %66 = arith.cmpf ogt, %64, %65 : vector<6x128xf32>
    %cst_30 = arith.constant 0.000000e+00 : f32
    %67 = vector.broadcast %cst_30 : f32 to vector<6x128xf32>
    %68 = arith.minimumf %64, %67 : vector<6x128xf32>
    %69 = math.exp %68 : vector<6x128xf32>
    %cst_31 = arith.constant 1.000000e+00 : f32
    %70 = vector.broadcast %cst_31 : f32 to vector<6x128xf32>
    %71 = arith.subf %69, %70 : vector<6x128xf32>
    %72 = arith.select %66, %64, %71 : vector<6x128xi1>, vector<6x128xf32>
    %c88 = arith.constant 88 : index
    %c0_32 = arith.constant 0 : index
    %73 = vector.load %arg2[%c88, %c0_32] : memref<216x256xf32, #tpu.memory_space<vmem>>, vector<128x32xf32>
    %c24 = arith.constant 24 : index
    %c0_33 = arith.constant 0 : index
    %74 = vector.load %arg2[%c24, %c0_33] : memref<216x256xf32, #tpu.memory_space<vmem>>, vector<1x16xf32>
    %cst_34 = arith.constant dense<0.000000e+00> : vector<6x32xf32>
    %75 = tpu.matmul %72, %73, %cst_34 {dimension_numbers = #tpu.dot_dimension_numbers<[1], [0], [0], [1], [0, 0, 1, 1], [], []>} : vector<6x128xf32>, vector<128x32xf32>, vector<6x32xf32> -> vector<6x32xf32>
    %76 = vector.extract_strided_slice %75 {offsets = [0, 0], sizes = [6, 16], strides = [1, 1]} : vector<6x32xf32> to vector<6x16xf32>
    %77 = vector.extract_strided_slice %75 {offsets = [0, 16], sizes = [6, 16], strides = [1, 1]} : vector<6x32xf32> to vector<6x16xf32>
    %78 = vector.extract_strided_slice %77 {offsets = [4, 0], sizes = [2, 16], strides = [1, 1]} : vector<6x16xf32> to vector<2x16xf32>
    %79 = vector.extract_strided_slice %77 {offsets = [0, 0], sizes = [4, 16], strides = [1, 1]} : vector<6x16xf32> to vector<4x16xf32>
    %80 = tpu.concatenate %78, %79 in 0 : vector<2x16xf32>, vector<4x16xf32> -> vector<6x16xf32>
    %81 = arith.addf %76, %80 : vector<6x16xf32>
    %82 = vector.broadcast %74 : vector<1x16xf32> to vector<6x16xf32>
    %83 = arith.addf %81, %82 : vector<6x16xf32>
    %c0_35 = arith.constant 0 : index
    %c0_36 = arith.constant 0 : index
    %84 = vector.load %arg3[%c0_35, %c0_36] : memref<6x16xf32, #tpu.memory_space<vmem>>, vector<6x16xf32>
    tpu.vector_store %arg3[%c0_35, %c0_36], %83 {strides = array<i32>} : memref<6x16xf32, #tpu.memory_space<vmem>>, vector<6x16xf32>,
    return
  }
}

</mosaic_0001>

<bundles_post_ra>
// kernel: tpu_custom_call.1
= control target key start
LH: loop header
LB: loop body
LE: loop exit
PB: predicated region body
PF: predicated region fallthrough
CT: control target
= control target key end

     0   :  { %8 = vsyncpa [#allocation3], 0  ;;  %s2498_s0 = inlined_call_operand.hbm [shape: f32[6,1024], index: 0, kind: input, shape index: {}]   ;;  %s2499_s1 = inlined_call_operand.hbm [shape: bf16[512,512], index: 1, kind: input, shape index: {}]   ;;  %s2500_s2 = inlined_call_operand.hbm [shape: f32[216,256], index: 2, kind: input, shape index: {}]   ;;  %s2501_s3 = inlined_call_operand.hbm [shape: f32[6,16], index: 3, kind: output, shape index: {}]  }
   0x1   :  { %9 = vsyncpa [#allocation6], 0  ;;  %s26_s14 = sshll.u32 %s2499_s1, 4  ;;  %s27_s14 = int_to_ptr.hbm [resolvable:$true] %s26_s14 }
   0x2   :  { %10 = vsyncpa [#allocation4], 0  ;;  %s2377_s15 = smov [#allocation5]   ;;  %s16_s19 = sshll.u32 %s2498_s0, 4  ;;  %s17_s19 = int_to_ptr.hbm [resolvable:$true] %s16_s19 }
   0x3   :  { %s28_s16 = sshll.u32 %s2377_s15, 4  ;;  %s2378_s20 = smov 256   ;;  %s29_s16 = int_to_ptr.vmem [resolvable:$true] %s28_s16 }
   0x4   :  { %s2379_s21 = smov 16   ;;  %s2380_s22 = smov [#allocation2]  }
   0x5   :  { %34 = dma.hbm_to_vmem [thread:$0]  %s27_s14, 16384, %s29_s16, [#allocation6], %s2378_s20, %s2378_s20, %s2379_s21  }
   0x6   :  { %s18_s23 = sshll.u32 %s2380_s22, 4  ;;  %s39_s26 = sshll.u32 %s2500_s2, 4  ;;  %s19_s23 = int_to_ptr.vmem [resolvable:$true] %s18_s23  ;;  %s40_s26 = int_to_ptr.hbm [resolvable:$true] %s39_s26 }
   0x7   :  { %21 = dma.hbm_to_vmem [thread:$0]  %s17_s19, 1024, %s19_s23, [#allocation3]  }
   0x8   :  { %s2381_s1 = smov [#allocation7]  }
   0x9   :  { %s41_s27 = sshll.u32 %s2381_s1, 4  ;;  %s42_s27 = int_to_ptr.vmem [resolvable:$true] %s41_s27 }
   0xa   :  { %47 = dma.hbm_to_vmem [thread:$0]  %s40_s26, 6912, %s42_s27, [#allocation6], %s2378_s20, %s2378_s20, %s2379_s21  }
   0xb   :  { %2371 = dma.done.wait [#allocation3], 1024  }
   0xc   :  { %2372 = vsyncadd [#allocation3], 4294966272 }
   0xd   :  { %2373 = dma.done.wait [#allocation6], 23296  }
   0xe   :  { %2374 = vsyncadd [#allocation6], 4294944000  ;;  %v2382_v0 = vmov 6   ;;  %vm102_vm0 = vcmask 1045504   ;;  %vm93_vm1 = vcmask 48128   ;;  %v61_v5 = vld [vmem:[#allocation7 + $0x50] sm:$0xff] }
   0xf   :  { %2265 = vset.pattern.permute.xlu0 %v2382_v0  ;;  %2266 = vset.pattern.permute.xlu1 %v2382_v0  ;;  %v65_v1 = vld [vmem:[#allocation2] sm:$0x3f]  ;;  %v66_v2 = vld [vmem:[#allocation2 + $0x8] sm:$0x3f]  ;;  %v67_v3 = vld [vmem:[#allocation2 + $0x10] sm:$0x3f] }
  0x10   :  { %1605 = vmatpush.msk.msra.mxu0 %vm102_vm0, %v65_v1  ;;  %1610 = vmatpush.msk.msra.mxu1 %vm102_vm0, %v66_v2  ;;  %v68_v4 = vld [vmem:[#allocation2 + $0x18] sm:$0x3f]  ;;  %v71_v6 = vld [vmem:[#allocation2 + $0x30] sm:$0x3f]  ;;  %v69_v7 = vld [vmem:[#allocation2 + $0x20] sm:$0x3f] }
  0x11   :  { %1615 = vmatpush.msk.msra.mxu2 %vm102_vm0, %v67_v3  ;;  %1620 = vmatpush.msk.msra.mxu3 %vm102_vm0, %v68_v4  ;;  %v72_v8 = vld [vmem:[#allocation2 + $0x38] sm:$0x3f]  ;;  %v70_v9 = vld [vmem:[#allocation2 + $0x28] sm:$0x3f]  ;;  %v62_v10 = vld [vmem:[#allocation7 + $0x60] sm:$0xff]  ;;  %vm438_vm3 = vcmask 7168  }
  0x12   :  { %1606 = vmatmul.msk.f32.vlgmr.msra.gmra.mxu0 %vm93_vm1, %v61_v5  ;;  %1611 = vmatmul.msk.f32.vlgmr.msra.gmra.mxu1 %vm93_vm1, %v61_v5  ;;  %v63_v11 = vld [vmem:[#allocation7 + $0x70] sm:$0xff]  ;;  %v64_v12 = vld [vmem:[#allocation7 + $0x80] sm:$0xff]  ;;  %vm476_vm4 = vcmask 130048   ;;  %vm550_vm5 = vcmask 523264   ;;  %vm743_vm6 = vcmask 1043456   ;;  %vm740_vm7 = vcmask 1041408  }
  0x13   :  { %1616 = vmatmul.msk.f32.vlgmr.msra.gmra.mxu2 %vm93_vm1, %v61_v5  ;;  %1621 = vmatmul.msk.f32.vlgmr.msra.gmra.mxu3 %vm93_vm1, %v61_v5  ;;  %s2384_s0 = smov 112   ;;  %s2385_s2 = smov [#allocation8]   ;;  %vm1585_vm11 = vcmask 128000  }
  0x14   :  { %1635 = vmatpush.msk.msrb.mxu2 %vm102_vm0, %v71_v6  ;;  %1625 = vmatpush.msk.msrb.mxu0 %vm102_vm0, %v69_v7  ;;  %s1592_s28 = sshll.u32 %s2385_s2, 4  ;;  %s1594_s4 = sshll.u32 %s2501_s3, 4  ;;  %s1593_s28 = int_to_ptr.vmem [resolvable:$true] %s1592_s28  ;;  %s1595_s4 = int_to_ptr.hbm [resolvable:$true] %s1594_s4 }
  0x15   :  { %1640 = vmatpush.msk.msrb.mxu3 %vm102_vm0, %v72_v8  ;;  %1630 = vmatpush.msk.msrb.mxu1 %vm102_vm0, %v70_v9 }
  0x16   :  { %75 = vperm.xlu0 %2265, %v61_v5   ;;  %80 = vperm.xlu1 %2266, %v62_v10  }
  0x1a   :  { %1607 = vmatmul.msk.f32.gmra.mxu0 %vm93_vm1, %v62_v10  ;;  %1612 = vmatmul.msk.f32.gmra.mxu1 %vm93_vm1, %v62_v10 }
  0x1b   :  { %1617 = vmatmul.msk.f32.gmra.mxu2 %vm93_vm1, %v62_v10  ;;  %1622 = vmatmul.msk.f32.gmra.mxu3 %vm93_vm1, %v62_v10 }
  0x1e   :  { %85 = vperm.xlu0 %2265, %v63_v11   ;;  %90 = vperm.xlu1 %2266, %v64_v12  }
  0x22   :  { %1608 = vmatmul.msk.f32.gmra.mxu0 %vm93_vm1, %v63_v11  ;;  %1613 = vmatmul.msk.f32.gmra.mxu1 %vm93_vm1, %v63_v11 }
  0x23   :  { %1618 = vmatmul.msk.f32.gmra.mxu2 %vm93_vm1, %v63_v11  ;;  %1623 = vmatmul.msk.f32.gmra.mxu3 %vm93_vm1, %v63_v11 }
  0x2a   :  { %1609 = vmatmul.msk.f32.gmra.mxu0 %vm93_vm1, %v64_v12  ;;  %1614 = vmatmul.msk.f32.gmra.mxu1 %vm93_vm1, %v64_v12 }
  0x2b   :  { %1619 = vmatmul.msk.f32.gmra.mxu2 %vm93_vm1, %v64_v12  ;;  %1624 = vmatmul.msk.f32.gmra.mxu3 %vm93_vm1, %v64_v12 }
  0x32   :  { %1626 = vmatmul.msk.f32.vlgmr.msrb.gmra.mxu0 %vm93_vm1, %v61_v5  ;;  %1631 = vmatmul.msk.f32.vlgmr.msrb.gmra.mxu1 %vm93_vm1, %v61_v5 }
  0x33   :  { %1636 = vmatmul.msk.f32.vlgmr.msrb.gmra.mxu2 %vm93_vm1, %v61_v5  ;;  %1641 = vmatmul.msk.f32.vlgmr.msrb.gmra.mxu3 %vm93_vm1, %v61_v5 }
  0x3a   :  { %1627 = vmatmul.msk.f32.gmra.mxu0 %vm93_vm1, %v62_v10  ;;  %1632 = vmatmul.msk.f32.gmra.mxu1 %vm93_vm1, %v62_v10 }
  0x3b   :  { %1637 = vmatmul.msk.f32.gmra.mxu2 %vm93_vm1, %v62_v10  ;;  %1642 = vmatmul.msk.f32.gmra.mxu3 %vm93_vm1, %v62_v10 }
  0x42   :  { %1628 = vmatmul.msk.f32.gmra.mxu0 %vm93_vm1, %v63_v11  ;;  %1633 = vmatmul.msk.f32.gmra.mxu1 %vm93_vm1, %v63_v11 }
  0x43   :  { %1638 = vmatmul.msk.f32.gmra.mxu2 %vm93_vm1, %v63_v11  ;;  %1643 = vmatmul.msk.f32.gmra.mxu3 %vm93_vm1, %v63_v11 }
  0x4a   :  { %1629 = vmatmul.msk.f32.gmra.mxu0 %vm93_vm1, %v64_v12  ;;  %1634 = vmatmul.msk.f32.gmra.mxu1 %vm93_vm1, %v64_v12 }
  0x4b   :  { %1639 = vmatmul.msk.f32.gmra.mxu2 %vm93_vm1, %v64_v12  ;;  %1644 = vmatmul.msk.f32.gmra.mxu3 %vm93_vm1, %v64_v12 }
  0x88   :  { %v76_v23 = vpop.permute.xlu0 %75  ;;  %v81_v33 = vpop.permute.xlu1 %80 }
  0x8f   :  { %v144_v13 = vpop.f32.mrf.mxu0  ;;  %v173_v14 = vpop.f32.mrf.mxu1 }
  0x90   :  { %v145_v24 = vadd.f32 %v144_v13, %v76_v23  ;;  %v174_v25 = vadd.f32 %v173_v14, %v76_v23  ;;  %v2457_v49 = vpop.permute.xlu0 %85  ;;  %v2462_v8 = vpop.permute.xlu1 %90 }
  0x92   :  { %v359_v31 = vmax.f32 %v145_v24, 0.0  ;;  %v360_v32 = vmax.f32 %v174_v25, 0.0 }
  0x94   :  { %v391_v36 = vadd.f32 %v360_v32, %v359_v31 }
  0x96   :  { %v202_v15 = vpop.f32.mrf.mxu2  ;;  %v231_v16 = vpop.f32.mrf.mxu3 }
  0x97   :  { %v147_v17 = vpop.f32.mrf.mxu0  ;;  %v176_v18 = vpop.f32.mrf.mxu1  ;;  %v203_v28 = vadd.f32 %v202_v15, %v76_v23  ;;  %v232_v35 = vadd.f32 %v231_v16, %v76_v23 }
  0x98   :  { %v148_v37 = vadd.f32 %v147_v17, %v81_v33  ;;  %v177_v38 = vadd.f32 %v176_v18, %v81_v33 }
  0x99   :  { %v361_v34 = vmax.f32 %v203_v28, 0.0  ;;  %v362_v42 = vmax.f32 %v232_v35, 0.0 }
  0x9a   :  { %v367_v47 = vmax.f32 %v148_v37, 0.0  ;;  %v368_v48 = vmax.f32 %v177_v38, 0.0 }
  0x9b   :  { %v392_v41 = vadd.f32 %v391_v36, %v361_v34 }
  0x9c   :  { %v400_v57 = vadd.f32 %v368_v48, %v367_v47 }
  0x9d   :  { %v393_v52 = vadd.f32 %v392_v41, %v362_v42 }
  0x9e   :  { %v205_v19 = vpop.f32.mrf.mxu2  ;;  %v234_v20 = vpop.f32.mrf.mxu3 }
  0x9f   :  { %v150_v21 = vpop.f32.mrf.mxu0  ;;  %v179_v22 = vpop.f32.mrf.mxu1  ;;  %v206_v43 = vadd.f32 %v205_v19, %v81_v33  ;;  %v235_v54 = vadd.f32 %v234_v20, %v81_v33 }
  0xa0   :  { %v151_v55 = vadd.f32 %v150_v21, %v2457_v49  ;;  %v180_v56 = vadd.f32 %v179_v22, %v2457_v49 }
  0xa1   :  { %v369_v53 = vmax.f32 %v206_v43, 0.0  ;;  %v370_v0 = vmax.f32 %v235_v54, 0.0 }
  0xa2   :  { %v375_v5 = vmax.f32 %v151_v55, 0.0  ;;  %v376_v6 = vmax.f32 %v180_v56, 0.0 }
  0xa3   :  { %v401_v63 = vadd.f32 %v400_v57, %v369_v53 }
  0xa4   :  { %v409_v18 = vadd.f32 %v376_v6, %v375_v5 }
  0xa5   :  { %v402_v15 = vadd.f32 %v401_v63, %v370_v0 }
  0xa6   :  { %v208_v26 = vpop.f32.mrf.mxu2  ;;  %v237_v27 = vpop.f32.mrf.mxu3 }
  0xa7   :  { %v153_v29 = vpop.f32.mrf.mxu0  ;;  %v182_v30 = vpop.f32.mrf.mxu1  ;;  %v209_v60 = vadd.f32 %v208_v26, %v2457_v49  ;;  %v238_v13 = vadd.f32 %v237_v27, %v2457_v49 }
  0xa8   :  { %v154_v19 = vadd.f32 %v153_v29, %v2462_v8  ;;  %v183_v20 = vadd.f32 %v182_v30, %v2462_v8 }
  0xa9   :  { %v377_v12 = vmax.f32 %v209_v60, 0.0  ;;  %v378_v25 = vmax.f32 %v238_v13, 0.0 }
  0xaa   :  { %v383_v37 = vmax.f32 %v154_v19, 0.0  ;;  %v384_v29 = vmax.f32 %v183_v20, 0.0 }
  0xab   :  { %v410_v24 = vadd.f32 %v409_v18, %v377_v12 }
  0xad   :  { %v411_v41 = vadd.f32 %v410_v24, %v378_v25 }
  0xae   :  { %v211_v39 = vpop.f32.mrf.mxu2  ;;  %v2455_v40 = vpop.f32.mrf.mxu3 }
  0xaf   :  { %v260_v44 = vpop.f32.mrf.mxu0  ;;  %v289_v45 = vpop.f32.mrf.mxu1  ;;  %v212_v31 = vadd.f32 %v211_v39, %v2462_v8  ;;  %v241_v42 = vadd.f32 %v2455_v40, %v2462_v8 }
  0xb0   :  { %v261_v46 = vadd.f32 %v260_v44, %v76_v23  ;;  %v290_v50 = vadd.f32 %v289_v45, %v76_v23 }
  0xb1   :  { %v385_v44 = vmax.f32 %v212_v31, 0.0 }
  0xb2   :  { %v363_v51 = vmax.f32 %v261_v46, 0.0  ;;  %v364_v59 = vmax.f32 %v290_v50, 0.0  ;;  %v386_v50 = vmax.f32 %v241_v42, 0.0 }
  0xb4   :  { %v394_v58 = vadd.f32 %v393_v52, %v363_v51 }
  0xb6   :  { %v318_v61 = vpop.f32.mrf.mxu2  ;;  %v347_v62 = vpop.f32.mrf.mxu3  ;;  %v395_v9 = vadd.f32 %v394_v58, %v364_v59 }
  0xb7   :  { %v319_v1 = vadd.f32 %v318_v61, %v76_v23  ;;  %v348_v2 = vadd.f32 %v347_v62, %v76_v23  ;;  %v263_v3 = vpop.f32.mrf.mxu0  ;;  %v292_v4 = vpop.f32.mrf.mxu1 }
  0xb8   :  { %v264_v7 = vadd.f32 %v263_v3, %v81_v33  ;;  %v293_v11 = vadd.f32 %v292_v4, %v81_v33 }
  0xb9   :  { %v365_v10 = vmax.f32 %v319_v1, 0.0  ;;  %v366_v16 = vmax.f32 %v348_v2, 0.0 }
  0xba   :  { %v371_v14 = vmax.f32 %v264_v7, 0.0  ;;  %v372_v22 = vmax.f32 %v293_v11, 0.0 }
  0xbb   :  { %v396_v17 = vadd.f32 %v395_v9, %v365_v10 }
  0xbc   :  { %v403_v21 = vadd.f32 %v402_v15, %v371_v14  ;;  %v2383_v14 = vmov 1024.0  }
  0xbd   :  { %v397_v23 = vadd.f32 %v396_v17, %v366_v16  ;;  %2267 = vrcp.f32 %v2383_v14  ;;  %v474_v16 = vld [vmem:[#allocation7 + $0xa0] sm:$0xff]  ;;  %v473_v17 = vld [vmem:[#allocation7 + $0x90] sm:$0xff] }
  0xbe   :  { %v321_v26 = vpop.f32.mrf.mxu2  ;;  %v350_v28 = vpop.f32.mrf.mxu3  ;;  %v404_v38 = vadd.f32 %v403_v21, %v372_v22  ;;  %494 = vmatpush.msra.mxu0 %v474_v16  ;;  %v2143_v14 = vld [vmem:[#allocation5 + $0x84] sm:$0xf] }
  0xbf   :  { %v322_v32 = vadd.f32 %v321_v26, %v81_v33  ;;  %v351_v27 = vadd.f32 %v350_v28, %v81_v33  ;;  %398 = vadd.xlane.f32.xlu2 %v397_v23  ;;  %v266_v34 = vpop.f32.mrf.mxu0  ;;  %v295_v35 = vpop.f32.mrf.mxu1  ;;  %v418_v33 = vadd.f32 %v384_v29, %v383_v37  ;;  %v2139_v37 = vld [vmem:[#allocation5 + $0x44] sm:$0xf] }
  0xc0   :  { %v267_v36 = vadd.f32 %v266_v34, %v2457_v49  ;;  %v296_v39 = vadd.f32 %v295_v35, %v2457_v49  ;;  %495 = vmatpush.msra.mxu0 %v473_v17  ;;  %v2141_v35 = vld [vmem:[#allocation5 + $0x64] sm:$0xf] }
  0xc1   :  { %v373_v30 = vmax.f32 %v322_v32, 0.0  ;;  %v374_v46 = vmax.f32 %v351_v27, 0.0  ;;  %v419_v53 = vadd.f32 %v418_v33, %v385_v44  ;;  %v1658_v44 = vld [vmem:[#allocation5 + $0x30] sm:$0xf0]  ;;  %v1706_v33 = vld [vmem:[#allocation5 + $0xe0] sm:$0xf] }
  0xc2   :  { %v379_v43 = vmax.f32 %v267_v36, 0.0  ;;  %v380_v54 = vmax.f32 %v296_v39, 0.0  ;;  %v1674_v36 = vld [vmem:[#allocation5 + $0x70] sm:$0xf0]  ;;  %v2140_v39 = vld [vmem:[#allocation5 + $0x4c] sm:$0xf0] }
  0xc3   :  { %v405_v45 = vadd.f32 %v404_v38, %v373_v30  ;;  %v420_v62 = vadd.f32 %v419_v53, %v386_v50  ;;  %v2268_v15 = vpop.eup %2267  ;;  %v1677_v29 = vor.u32 %v2141_v35, %v1674_v36  ;;  %v1666_v38 = vld [vmem:[#allocation5 + $0x50] sm:$0xf0]  ;;  %v1672_v30 = vld [vmem:[#allocation5 + $0x60] sm:$0xf]  ;;  %v2154_v35 = vld [vmem:[#allocation5 + $0x12c] sm:$0xf0] }
  0xc4   :  { %v412_v47 = vadd.f32 %v411_v41, %v379_v43  ;;  %v428_v18 = vmul.f32 1024.0, %v2268_v15  ;;  %vm432_vm2 = vweird.f32 %v2268_v15  ;;  %v2142_v41 = vld [vmem:[#allocation5 + $0x6c] sm:$0xf0]  ;;  %v2137_v43 = vld [vmem:[#allocation5 + $0x24] sm:$0xf] }
  0xc5   :  { %v406_v48 = vadd.f32 %v405_v45, %v374_v46  ;;  %v1673_v42 = vor.u32 %v2142_v41, %v1672_v30  ;;  %v1664_v45 = vld [vmem:[#allocation5 + $0x40] sm:$0xf]  ;;  %571 = vmatpush.bf16.msra.mxu2 %v1677_v29  ;;  %v1669_v46 = vor.u32 %v2139_v37, %v1666_v38  ;;  %v2151_v29 = vld [vmem:[#allocation5 + $0x104] sm:$0xf]  ;;  %v1718_v38 = vld [vmem:[#allocation5 + $0x110] sm:$0xf0] }
  0xc6   :  { %v324_v51 = vpop.f32.mrf.mxu2  ;;  %v353_v52 = vpop.f32.mrf.mxu3  ;;  %v413_v59 = vadd.f32 %v412_v47, %v380_v54  ;;  %v429_v19 = vsub.f32 1.0, %v428_v18  ;;  %v2150_v47 = vld [vmem:[#allocation5 + $0xec] sm:$0xf0]  ;;  %v1698_v53 = vld [vmem:[#allocation5 + $0xc0] sm:$0xf] }
  0xc7   :  { %v325_v55 = vadd.f32 %v324_v51, %v2457_v49  ;;  %v354_v56 = vadd.f32 %v353_v52, %v2457_v49  ;;  %407 = vadd.xlane.f32.xlu0 %v406_v48  ;;  %v269_v40 = vpop.f32.mrf.mxu0  ;;  %v298_v58 = vpop.f32.mrf.mxu1  ;;  %558 = vmatpush.bf16.msra.mxu1 %v1673_v42  ;;  %v1665_v48 = vor.u32 %v2140_v39, %v1664_v45  ;;  %v2149_v51 = vld [vmem:[#allocation5 + $0xe4] sm:$0xf]  ;;  %v1708_v52 = vld [vmem:[#allocation5 + $0xf0] sm:$0xf0]  ;;  %v1716_v30 = vld [vmem:[#allocation5 + $0x100] sm:$0xf] }
  0xc8   :  { %v270_v57 = vadd.f32 %v269_v40, %v2462_v8  ;;  %v299_v1 = vadd.f32 %v298_v58, %v2462_v8  ;;  %v430_v20 = vmul.f32 %v2268_v15, %v429_v19  ;;  %v1707_v50 = vor.u32 %v2150_v47, %v1706_v33  ;;  %v1700_v40 = vld [vmem:[#allocation5 + $0xd0] sm:$0xf0]  ;;  %v2157_v18 = vld [vmem:[#allocation5 + $0x164] sm:$0xf]  ;;  %v2152_v41 = vld [vmem:[#allocation5 + $0x10c] sm:$0xf0] }
  0xc9   :  { %v381_v60 = vmax.f32 %v325_v55, 0.0  ;;  %v382_v0 = vmax.f32 %v354_v56, 0.0  ;;  %v1711_v54 = vor.u32 %v2149_v51, %v1708_v52  ;;  %v2148_v55 = vld [vmem:[#allocation5 + $0xcc] sm:$0xf0]  ;;  %v2147_v56 = vld [vmem:[#allocation5 + $0xc4] sm:$0xf]  ;;  %572 = vmatpush.bf16.msra.mxu2 %v1669_v46  ;;  %v1661_v58 = vor.u32 %v2137_v43, %v1658_v44 }
  0xca   :  { %v387_v61 = vmax.f32 %v270_v57, 0.0  ;;  %v388_v6 = vmax.f32 %v299_v1, 0.0  ;;  %v431_v22 = vadd.f32 %v2268_v15, %v430_v20  ;;  %632 = vmatpush.bf16.msra.mxu3 %v1707_v50  ;;  %v1699_v57 = vor.u32 %v2148_v55, %v1698_v53  ;;  %v2138_v1 = vld [vmem:[#allocation5 + $0x2c] sm:$0xf0]  ;;  %v1742_v19 = vld [vmem:[#allocation5 + $0x170] sm:$0xf0] }
  0xcb   :  { %v414_v63 = vadd.f32 %v413_v59, %v381_v60  ;;  %645 = vmatpush.bf16.msrb.mxu0 %v1711_v54  ;;  %v1703_v59 = vor.u32 %v2147_v56, %v1700_v40  ;;  %559 = vmatpush.bf16.msra.mxu1 %v1665_v48  ;;  %v2135_v60 = vld [vmem:[#allocation5 + $0x4] sm:$0xf]  ;;  %v1740_v20 = vld [vmem:[#allocation5 + $0x160] sm:$0xf]  ;;  %v1721_v42 = vor.u32 %v2151_v29, %v1718_v38  ;;  %v2189_v45 = vld [vmem:[#allocation5 + $0x2ec] sm:$0xf0] }
  0xcc   :  { %v421_v2 = vadd.f32 %v420_v62, %v387_v61  ;;  %v1650_v61 = vld [vmem:[#allocation5 + $0x10] sm:$0xf0]  ;;  %v1717_v43 = vor.u32 %v2152_v41, %v1716_v30  ;;  %v1862_v44 = vld [vmem:[#allocation5 + $0x2e0] sm:$0xf]  ;;  %v2185_v33 = vld [vmem:[#allocation5 + $0x2cc] sm:$0xf0] }
  0xcd   :  { %v415_v3 = vadd.f32 %v414_v63, %v382_v0  ;;  %573 = vmatpush.bf16.msra.mxu2 %v1661_v58  ;;  %v1653_v62 = vor.u32 %v2135_v60, %v1650_v61  ;;  %v1656_v0 = vld [vmem:[#allocation5 + $0x20] sm:$0xf]  ;;  %v1863_v46 = vor.u32 %v2189_v45, %v1862_v44  ;;  %v2221_v50 = vld [vmem:[#allocation5 + $0x3ec] sm:$0xf0]  ;;  %v2167_v41 = vld [vmem:[#allocation5 + $0x244] sm:$0xf] }
  0xce   :  { %v327_v4 = vpop.f32.mrf.mxu2  ;;  %v356_v5 = vpop.f32.mrf.mxu3  ;;  %v422_v9 = vadd.f32 %v421_v2, %v388_v6  ;;  %633 = vmatpush.bf16.msra.mxu3 %v1699_v57  ;;  %v1690_v2 = vld [vmem:[#allocation5 + $0xa0] sm:$0xf]  ;;  %v1692_v6 = vld [vmem:[#allocation5 + $0xb0] sm:$0xf0]  ;;  %v2181_v53 = vld [vmem:[#allocation5 + $0x2ac] sm:$0xf0] }
  0xcf   :  { %v328_v49 = vadd.f32 %v327_v4, %v2462_v8  ;;  %v357_v7 = vadd.f32 %v356_v5, %v2462_v8  ;;  %416 = vadd.xlane.f32.xlu2 %v415_v3  ;;  %v433_v8 = vsel %vm432_vm2, %v2268_v15, %v431_v22  ;;  %646 = vmatpush.bf16.msrb.mxu0 %v1703_v59  ;;  %v2146_v4 = vld [vmem:[#allocation5 + $0xac] sm:$0xf0]  ;;  %v2145_v5 = vld [vmem:[#allocation5 + $0xa4] sm:$0xf]  ;;  %v1684_v15 = vld [vmem:[#allocation5 + $0x90] sm:$0xf0] }
  0xd0   :  { %v1657_v3 = vor.u32 %v2138_v1, %v1656_v0  ;;  %v1687_v17 = vor.u32 %v2143_v14, %v1684_v15  ;;  %v2158_v22 = vld [vmem:[#allocation5 + $0x16c] sm:$0xf0]  ;;  %v1846_v39 = vld [vmem:[#allocation5 + $0x2c0] sm:$0xf]  ;;  %v2187_v0 = vld [vmem:[#allocation5 + $0x2e4] sm:$0xf] }
  0xd1   :  { %v389_v10 = vmax.f32 %v328_v49, 0.0  ;;  %v390_v12 = vmax.f32 %v357_v7, 0.0  ;;  %574 = vmatpush.bf16.msra.mxu2 %v1653_v62  ;;  %v1691_v49 = vor.u32 %v2146_v4, %v1690_v2  ;;  %v1695_v7 = vor.u32 %v2145_v5, %v1692_v6  ;;  %v1990_v47 = vld [vmem:[#allocation5 + $0x3e0] sm:$0xf]  ;;  %v2217_v55 = vld [vmem:[#allocation5 + $0x3cc] sm:$0xf0] }
  0xd2   :  { %560 = vmatpush.bf16.msra.mxu1 %v1657_v3  ;;  %v1847_v48 = vor.u32 %v2185_v33, %v1846_v39  ;;  %v1991_v51 = vor.u32 %v2221_v50, %v1990_v47  ;;  %v1830_v52 = vld [vmem:[#allocation5 + $0x2a0] sm:$0xf]  ;;  %v2177_v59 = vld [vmem:[#allocation5 + $0x28c] sm:$0xf0]  ;;  %v1864_v1 = vld [vmem:[#allocation5 + $0x2f0] sm:$0xf0] }
  0xd3   :  { %v423_v11 = vadd.f32 %v422_v9, %v389_v10  ;;  %634 = vmatpush.bf16.msra.mxu3 %v1691_v49  ;;  %647 = vmatpush.bf16.msrb.mxu0 %v1695_v7  ;;  %v1648_v9 = vld [vmem:[#allocation5] sm:$0xf]  ;;  %v2136_v10 = vld [vmem:[#allocation5 + $0xc] sm:$0xf0]  ;;  %v1831_v57 = vor.u32 %v2181_v53, %v1830_v52  ;;  %v2219_v2 = vld [vmem:[#allocation5 + $0x3e4] sm:$0xf] }
  0xd4   :  { %v1974_v54 = vld [vmem:[#allocation5 + $0x3c0] sm:$0xf]  ;;  %v2213_v61 = vld [vmem:[#allocation5 + $0x3ac] sm:$0xf0]  ;;  %v1992_v4 = vld [vmem:[#allocation5 + $0x3f0] sm:$0xf0] }
  0xd5   :  { %v424_v13 = vadd.f32 %v423_v11, %v390_v12  ;;  %v1682_v11 = vld [vmem:[#allocation5 + $0x80] sm:$0xf]  ;;  %v1649_v12 = vor.u32 %v2136_v10, %v1648_v9  ;;  %v1975_v56 = vor.u32 %v2217_v55, %v1974_v54  ;;  %v2173_v49 = vld [vmem:[#allocation5 + $0x26c] sm:$0xf0]  ;;  %v1995_v14 = vor.u32 %v2219_v2, %v1992_v4  ;;  %v1848_v15 = vld [vmem:[#allocation5 + $0x2d0] sm:$0xf0] }
  0xd6   :  { %v475_v40 = vld [vmem:[#allocation7 + $0x40] ss:$0 sm:$0xff]  ;;  %v2209_v10 = vld [vmem:[#allocation5 + $0x38c] sm:$0xf0]  ;;  %v2203_v39 = vld [vmem:[#allocation5 + $0x364] sm:$0xf] }
  0xd7   :  { %425 = vadd.xlane.f32.xlu1 %v424_v13  ;;  %v2144_v13 = vld [vmem:[#allocation5 + $0x8c] sm:$0xf0]  ;;  %561 = vmatpush.bf16.msra.mxu1 %v1649_v12  ;;  %v1814_v58 = vld [vmem:[#allocation5 + $0x280] sm:$0xf]  ;;  %v1867_v12 = vor.u32 %v2187_v0, %v1864_v1  ;;  %v1928_v47 = vld [vmem:[#allocation5 + $0x370] sm:$0xf0] }
  0xd8   :  { %v1683_v16 = vor.u32 %v2144_v13, %v1682_v11  ;;  %648 = vmatpush.bf16.msrb.mxu0 %v1687_v17  ;;  %v1958_v60 = vld [vmem:[#allocation5 + $0x3a0] sm:$0xf]  ;;  %v1815_v5 = vor.u32 %v2177_v59, %v1814_v58  ;;  %v2183_v13 = vld [vmem:[#allocation5 + $0x2c4] sm:$0xf]  ;;  %v1976_v17 = vld [vmem:[#allocation5 + $0x3d0] sm:$0xf0] }
  0xd9   :  { %v1959_v3 = vor.u32 %v2213_v61, %v1958_v60  ;;  %v1798_v6 = vld [vmem:[#allocation5 + $0x260] sm:$0xf]  ;;  %v2169_v30 = vld [vmem:[#allocation5 + $0x24c] sm:$0xf0]  ;;  %v2163_v52 = vld [vmem:[#allocation5 + $0x224] sm:$0xf] }
  0xda   :  { %635 = vmatpush.bf16.msra.mxu3 %v1683_v16  ;;  %v1942_v9 = vld [vmem:[#allocation5 + $0x380] sm:$0xf]  ;;  %v2215_v16 = vld [vmem:[#allocation5 + $0x3c4] sm:$0xf]  ;;  %v1768_v54 = vld [vmem:[#allocation5 + $0x230] sm:$0xf0] }
  0xdb   :  { %v1782_v38 = vld [vmem:[#allocation5 + $0x240] sm:$0xf]  ;;  %v1771_v55 = vor.u32 %v2163_v52, %v1768_v54  ;;  %v1912_v59 = vld [vmem:[#allocation5 + $0x350] sm:$0xf0]  ;;  %v2159_v0 = vld [vmem:[#allocation5 + $0x204] sm:$0xf] }
  0xdc   :  { %v1926_v45 = vld [vmem:[#allocation5 + $0x360] sm:$0xf]  ;;  %v1752_v1 = vld [vmem:[#allocation5 + $0x210] sm:$0xf0]  ;;  %v1870_v2 = vld [vmem:[#allocation5 + $0x2e8] sm:$0xf] }
  0xdd   :  { %v1766_v50 = vld [vmem:[#allocation5 + $0x220] sm:$0xf]  ;;  %v2190_v4 = vld [vmem:[#allocation5 + $0x2f4] sm:$0xf0]  ;;  %v1966_v52 = vld [vmem:[#allocation5 + $0x3a8] sm:$0xf] }
  0xde   :  { %1138 = vmatpush.bf16.msrb.mxu3 %v1863_v46  ;;  %v2205_v46 = vld [vmem:[#allocation5 + $0x36c] sm:$0xf0]  ;;  %v1750_v61 = vld [vmem:[#allocation5 + $0x200] sm:$0xf]  ;;  %v2212_v54 = vld [vmem:[#allocation5 + $0x3ac] sm:$0xf] }
  0xdf   :  { %v1927_v33 = vor.u32 %v2205_v46, %v1926_v45  ;;  %v1984_v45 = vld [vmem:[#allocation5 + $0x3d8] sm:$0xf0] }
  0xe2   :  { %1139 = vmatpush.bf16.msrb.mxu3 %v1847_v48  ;;  %v1931_v48 = vor.u32 %v2203_v39, %v1928_v47  ;;  %v1822_v39 = vld [vmem:[#allocation5 + $0x288] sm:$0xf] }
  0xe6   :  { %1140 = vmatpush.bf16.msrb.mxu3 %v1831_v57  ;;  %v2199_v57 = vld [vmem:[#allocation5 + $0x344] sm:$0xf] }
  0xe7   :  { %v1915_v60 = vor.u32 %v2199_v57, %v1912_v59  ;;  %v1806_v57 = vld [vmem:[#allocation5 + $0x268] sm:$0xf]  ;;  %v2172_v59 = vld [vmem:[#allocation5 + $0x26c] sm:$0xf] }
  0xea   :  { %1141 = vmatpush.bf16.msrb.mxu3 %v1815_v5  ;;  %v2188_v5 = vld [vmem:[#allocation5 + $0x2ec] sm:$0xf] }
 0x132   :  { %v399_v21 = vpop.xlane.xlu2 %398 }
 0x133   :  { %v434_v24 = vmul.f32 %v433_v8, %v399_v21  ;;  %v1745_v21 = vor.u32 %v2157_v18, %v1742_v19  ;;  %v1799_v18 = vor.u32 %v2173_v49, %v1798_v6  ;;  %v1943_v19 = vor.u32 %v2209_v10, %v1942_v9  ;;  %v1872_v6 = vld [vmem:[#allocation5 + $0x2f8] sm:$0xf0]  ;;  %v1894_v9 = vld [vmem:[#allocation5 + $0x320] sm:$0xf]  ;;  %v2197_v10 = vld [vmem:[#allocation5 + $0x32c] sm:$0xf0] }
 0x134   :  { %v1871_v49 = vor.u32 %v2190_v4, %v1870_v2  ;;  %v2208_v2 = vld [vmem:[#allocation5 + $0x38c] sm:$0xf] }
 0x135   :  { %719 = vmatpush.bf16.msrb.mxu2 %v1745_v21  ;;  %v2179_v21 = vld [vmem:[#allocation5 + $0x2a4] sm:$0xf]  ;;  %1142 = vmatpush.bf16.msrb.mxu3 %v1799_v18  ;;  %v2184_v18 = vld [vmem:[#allocation5 + $0x2cc] sm:$0xf] }
 0x13a   :  { %v408_v28 = vpop.xlane.xlu0 %407 }
 0x13b   :  { %v435_v32 = vmul.f32 %v433_v8, %v408_v28  ;;  %v2156_v28 = vld [vmem:[#allocation5 + $0x14c] sm:$0xf0] }
 0x142   :  { %v417_v23 = vpop.xlane.xlu2 %416 }
 0x143   :  { %v436_v25 = vmul.f32 %v433_v8, %v417_v23  ;;  %v2155_v23 = vld [vmem:[#allocation5 + $0x144] sm:$0xf] }
 0x145   :  { %v439_v26 = vsel %vm438_vm3, %v434_v24, %v436_v25  ;;  %v1734_v24 = vld [vmem:[#allocation5 + $0x150] sm:$0xf0]  ;;  %v1732_v25 = vld [vmem:[#allocation5 + $0x140] sm:$0xf] }
 0x146   :  { %441 = vxpose.xlu2.b32.start [1/2] (short) (narrow) %v439_v26, 8  ;;  %v1737_v26 = vor.u32 %v2155_v23, %v1734_v24  ;;  %v2211_v23 = vld [vmem:[#allocation5 + $0x3a4] sm:$0xf]  ;;  %v1960_v24 = vld [vmem:[#allocation5 + $0x3b0] sm:$0xf0] }
 0x148   :  { %720 = vmatpush.bf16.msrb.mxu2 %v1737_v26  ;;  %v2175_v26 = vld [vmem:[#allocation5 + $0x284] sm:$0xf] }
 0x14a   :  { %v426_v31 = vpop.xlane.xlu1 %425 }
 0x14b   :  { %v437_v27 = vmul.f32 %v433_v8, %v426_v31  ;;  %v1741_v8 = vor.u32 %v2158_v22, %v1740_v20  ;;  %v1733_v31 = vor.u32 %v2156_v28, %v1732_v25  ;;  %v1851_v20 = vor.u32 %v2183_v13, %v1848_v15  ;;  %v1896_v13 = vld [vmem:[#allocation5 + $0x330] sm:$0xf0]  ;;  %v2186_v15 = vld [vmem:[#allocation5 + $0x2d4] sm:$0xf0] }
 0x14c   :  { %v1979_v22 = vor.u32 %v2215_v16, %v1976_v17  ;;  %v1963_v28 = vor.u32 %v2211_v23, %v1960_v24  ;;  %v1880_v24 = vld [vmem:[#allocation5 + $0x310] sm:$0xf0] }
 0x14d   :  { %v440_v34 = vsel %vm438_vm3, %v435_v32, %v437_v27  ;;  %706 = vmatpush.bf16.msrb.mxu1 %v1741_v8  ;;  %v2153_v32 = vld [vmem:[#allocation5 + $0x124] sm:$0xf]  ;;  %v1726_v27 = vld [vmem:[#allocation5 + $0x130] sm:$0xf0] }
 0x14e   :  { %442 = vxpose.xlu2.b32.end [2/2] (short) (narrow) %v440_v34, 8  ;;  %v1724_v34 = vld [vmem:[#allocation5 + $0x120] sm:$0xf]  ;;  %v1729_v36 = vor.u32 %v2153_v32, %v1726_v27  ;;  %v1832_v8 = vld [vmem:[#allocation5 + $0x2b0] sm:$0xf0] }
 0x14f   :  { %v1725_v37 = vor.u32 %v2154_v35, %v1724_v34  ;;  %v1835_v25 = vor.u32 %v2179_v21, %v1832_v8  ;;  %v2207_v32 = vld [vmem:[#allocation5 + $0x384] sm:$0xf]  ;;  %v1944_v27 = vld [vmem:[#allocation5 + $0x390] sm:$0xf0]  ;;  %v1878_v21 = vld [vmem:[#allocation5 + $0x300] sm:$0xf] }
 0x150   :  { %721 = vmatpush.bf16.msrb.mxu2 %v1729_v36  ;;  %v1947_v35 = vor.u32 %v2207_v32, %v1944_v27  ;;  %v2171_v36 = vld [vmem:[#allocation5 + $0x264] sm:$0xf]  ;;  %v2220_v32 = vld [vmem:[#allocation5 + $0x3ec] sm:$0xf]  ;;  %v2000_v27 = vld [vmem:[#allocation5 + $0x3f8] sm:$0xf0] }
 0x151   :  { %707 = vmatpush.bf16.msrb.mxu1 %v1733_v31  ;;  %v1816_v31 = vld [vmem:[#allocation5 + $0x290] sm:$0xf0]  ;;  %v2191_v8 = vld [vmem:[#allocation5 + $0x304] sm:$0xf] }
 0x152   :  { %v1819_v34 = vor.u32 %v2175_v26, %v1816_v31  ;;  %v2222_v26 = vld [vmem:[#allocation5 + $0x3f4] sm:$0xf0] }
 0x154   :  { %722 = vmatpush.bf16.msrb.mxu2 %v1721_v42  ;;  %v1783_v42 = vor.u32 %v2169_v30, %v1782_v38  ;;  %v1840_v38 = vld [vmem:[#allocation5 + $0x2b8] sm:$0xf0] }
 0x155   :  { %708 = vmatpush.bf16.msrb.mxu1 %v1725_v37  ;;  %v1800_v37 = vld [vmem:[#allocation5 + $0x270] sm:$0xf0] }
 0x156   :  { %v1803_v29 = vor.u32 %v2171_v36, %v1800_v37  ;;  %1143 = vmatpush.bf16.msrb.mxu3 %v1783_v42  ;;  %v2182_v36 = vld [vmem:[#allocation5 + $0x2b4] sm:$0xf0]  ;;  %v2180_v37 = vld [vmem:[#allocation5 + $0x2ac] sm:$0xf] }
 0x157   :  { %v1843_v30 = vor.u32 %v2180_v37, %v1840_v38  ;;  %v2218_v42 = vld [vmem:[#allocation5 + $0x3d4] sm:$0xf0]  ;;  %v1902_v37 = vld [vmem:[#allocation5 + $0x328] sm:$0xf] }
 0x159   :  { %709 = vmatpush.bf16.msrb.mxu1 %v1717_v43  ;;  %v1784_v43 = vld [vmem:[#allocation5 + $0x250] sm:$0xf0] }
 0x15a   :  { %v1787_v44 = vor.u32 %v2167_v41, %v1784_v43  ;;  %v1982_v41 = vld [vmem:[#allocation5 + $0x3c8] sm:$0xf] }
 0x15b   :  { %v1983_v43 = vor.u32 %v2218_v42, %v1982_v41  ;;  %v2196_v41 = vld [vmem:[#allocation5 + $0x32c] sm:$0xf]  ;;  %v1904_v42 = vld [vmem:[#allocation5 + $0x338] sm:$0xf0] }
 0x1df   :  { %v457_v63 = vpop.trf.xlu2 }
 0x1e0   :  { %1645 = vmatmul.msk.f32.vlgmr.msra.gmra.mxu0 %vm476_vm4, %v457_v63 }
 0x1e1   :  { %1151 = vmatpush.bf16.msra.mxu0 %v1991_v51  ;;  %v2165_v51 = vld [vmem:[#allocation5 + $0x22c] sm:$0xf0] }
 0x1e2   :  { %v1767_v53 = vor.u32 %v2165_v51, %v1766_v50  ;;  %v1824_v50 = vld [vmem:[#allocation5 + $0x298] sm:$0xf0] }
 0x1e4   :  { %1144 = vmatpush.bf16.msrb.mxu3 %v1767_v53  ;;  %v2214_v53 = vld [vmem:[#allocation5 + $0x3b4] sm:$0xf0] }
 0x1e5   :  { %1152 = vmatpush.bf16.msra.mxu0 %v1975_v56  ;;  %v1910_v56 = vld [vmem:[#allocation5 + $0x340] sm:$0xf] }
 0x1e9   :  { %1153 = vmatpush.bf16.msra.mxu0 %v1959_v3  ;;  %v1755_v3 = vor.u32 %v2159_v0, %v1752_v1  ;;  %v2210_v0 = vld [vmem:[#allocation5 + $0x394] sm:$0xf0] }
 0x1ed   :  { %1154 = vmatpush.bf16.msra.mxu0 %v1943_v19  ;;  %v1856_v19 = vld [vmem:[#allocation5 + $0x2d8] sm:$0xf0] }
 0x1f1   :  { %1155 = vmatpush.bf16.msra.mxu0 %v1927_v33  ;;  %v2178_v33 = vld [vmem:[#allocation5 + $0x294] sm:$0xf0] }
 0x1f2   :  { %v1823_v47 = vor.u32 %v2178_v33, %v1822_v39  ;;  %v1886_v33 = vld [vmem:[#allocation5 + $0x308] sm:$0xf] }
 0x25d   :  { %v497_v62 = vpop.f32.mrf.mxu0 }
 0x25e   :  { %v498_v63 = vadd.f32 %v497_v62, %v475_v40  ;;  %v2201_v40 = vld [vmem:[#allocation5 + $0x34c] sm:$0xf0] }
 0x25f   :  { %v1911_v58 = vor.u32 %v2201_v40, %v1910_v56  ;;  %v2161_v62 = vld [vmem:[#allocation5 + $0x20c] sm:$0xf0]  ;;  %v1968_v56 = vld [vmem:[#allocation5 + $0x3b8] sm:$0xf0] }
 0x260   :  { %v500_v7 = vmax.f32 %v498_v63, 0.0  ;;  %v1751_v63 = vor.u32 %v2161_v62, %v1750_v61  ;;  %v1971_v40 = vor.u32 %v2212_v54, %v1968_v56  ;;  %v1808_v61 = vld [vmem:[#allocation5 + $0x278] sm:$0xf0] }
 0x261   :  { %1156 = vmatpush.bf16.msra.mxu0 %v1911_v58  ;;  %v2174_v58 = vld [vmem:[#allocation5 + $0x274] sm:$0xf0]  ;;  %v1811_v62 = vor.u32 %v2172_v59, %v1808_v61 }
 0x262   :  { %v501_v11 = vpack.c.bf16 %v500_v7, %v500_v7  ;;  %1145 = vmatpush.bf16.msrb.mxu3 %v1751_v63  ;;  %v1875_v7 = vor.u32 %v2188_v5, %v1872_v6  ;;  %v1950_v63 = vld [vmem:[#allocation5 + $0x388] sm:$0xf]  ;;  %v2170_v6 = vld [vmem:[#allocation5 + $0x254] sm:$0xf0] }
 0x263   :  { %v1951_v1 = vor.u32 %v2210_v0, %v1950_v63  ;;  %v1790_v5 = vld [vmem:[#allocation5 + $0x248] sm:$0xf] }
 0x264   :  { %1678 = vmatmul.msk.bf16.vlgmr.msra.gmra.mxu1 %vm550_vm5, %v501_v11  ;;  %1679 = vmatmul.msk.bf16.vlgmr.msra.gmra.mxu2 %vm550_vm5, %v501_v11 }
 0x265   :  { %1712 = vmatmul.msk.bf16.vlgmr.msra.gmra.mxu3 %vm550_vm5, %v501_v11  ;;  %1713 = vmatmul.msk.bf16.vlgmr.msrb.gmra.mxu0 %vm550_vm5, %v501_v11 }
 0x266   :  { %1164 = vmatpush.bf16.msra.mxu1 %v1867_v12  ;;  %1177 = vmatpush.bf16.msra.mxu2 %v1995_v14  ;;  %v1895_v12 = vor.u32 %v2197_v10, %v1894_v9  ;;  %v1854_v14 = vld [vmem:[#allocation5 + $0x2c8] sm:$0xf]  ;;  %v1792_v9 = vld [vmem:[#allocation5 + $0x258] sm:$0xf0] }
 0x267   :  { %1190 = vmatpush.bf16.msra.mxu3 %v1871_v49  ;;  %v1855_v17 = vor.u32 %v2186_v15, %v1854_v14  ;;  %v2168_v49 = vld [vmem:[#allocation5 + $0x24c] sm:$0xf]  ;;  %v1936_v15 = vld [vmem:[#allocation5 + $0x378] sm:$0xf0] }
 0x268   :  { %1157 = vmatpush.bf16.msra.mxu0 %v1895_v12  ;;  %v1795_v10 = vor.u32 %v2168_v49, %v1792_v9  ;;  %v2206_v12 = vld [vmem:[#allocation5 + $0x374] sm:$0xf0]  ;;  %v2064_v9 = vld [vmem:[#allocation5 + $0xe8] sm:$0xf] }
 0x26a   :  { %1165 = vmatpush.bf16.msra.mxu1 %v1851_v20  ;;  %1178 = vmatpush.bf16.msra.mxu2 %v1979_v22  ;;  %v1859_v20 = vor.u32 %v2184_v18, %v1856_v19  ;;  %v2193_v22 = vld [vmem:[#allocation5 + $0x30c] sm:$0xf0] }
 0x26b   :  { %v1879_v23 = vor.u32 %v2193_v22, %v1878_v21  ;;  %1191 = vmatpush.bf16.msra.mxu3 %v1855_v17  ;;  %v2166_v17 = vld [vmem:[#allocation5 + $0x234] sm:$0xf0]  ;;  %v1776_v21 = vld [vmem:[#allocation5 + $0x238] sm:$0xf0]  ;;  %v1918_v22 = vld [vmem:[#allocation5 + $0x348] sm:$0xf] }
 0x26d   :  { %1158 = vmatpush.bf16.msra.mxu0 %v1879_v23 }
 0x26e   :  { %1166 = vmatpush.bf16.msra.mxu1 %v1835_v25  ;;  %1179 = vmatpush.bf16.msra.mxu2 %v1963_v28  ;;  %v1998_v25 = vld [vmem:[#allocation5 + $0x3e8] sm:$0xf]  ;;  %v1883_v28 = vor.u32 %v2191_v8, %v1880_v24  ;;  %v2202_v24 = vld [vmem:[#allocation5 + $0x354] sm:$0xf0] }
 0x26f   :  { %v1999_v31 = vor.u32 %v2222_v26, %v1998_v25  ;;  %v2200_v25 = vld [vmem:[#allocation5 + $0x34c] sm:$0xf]  ;;  %v1920_v26 = vld [vmem:[#allocation5 + $0x358] sm:$0xf0] }
 0x271   :  { %1203 = vmatpush.bf16.msrb.mxu0 %v1999_v31  ;;  %v1919_v31 = vor.u32 %v2202_v24, %v1918_v22  ;;  %v2254_v22 = vld [vmem:[#allocation5 + $0x1f4] sm:$0xf0]  ;;  %v2130_v24 = vld [vmem:[#allocation5 + $0x1f8] sm:$0xf0] }
 0x272   :  { %1167 = vmatpush.bf16.msra.mxu1 %v1819_v34  ;;  %1180 = vmatpush.bf16.msra.mxu2 %v1947_v35  ;;  %v2003_v34 = vor.u32 %v2220_v32, %v2000_v27  ;;  %v1838_v35 = vld [vmem:[#allocation5 + $0x2a8] sm:$0xf]  ;;  %v2162_v27 = vld [vmem:[#allocation5 + $0x214] sm:$0xf0] }
 0x273   :  { %v1758_v32 = vld [vmem:[#allocation5 + $0x208] sm:$0xf] }
 0x274   :  { %1746 = vmatmul.msk.bf16.vlgmr.msrb.gmra.mxu1 %vm550_vm5, %v501_v11  ;;  %1747 = vmatmul.msk.bf16.vlgmr.msrb.gmra.mxu2 %vm550_vm5, %v501_v11  ;;  %v2195_v11 = vld [vmem:[#allocation5 + $0x324] sm:$0xf] }
 0x275   :  { %v1899_v16 = vor.u32 %v2195_v11, %v1896_v13  ;;  %1204 = vmatpush.bf16.msrb.mxu0 %v1983_v43  ;;  %v1934_v11 = vld [vmem:[#allocation5 + $0x368] sm:$0xf]  ;;  %v2204_v13 = vld [vmem:[#allocation5 + $0x36c] sm:$0xf] }
 0x276   :  { %1168 = vmatpush.bf16.msra.mxu1 %v1803_v29  ;;  %1181 = vmatpush.bf16.msra.mxu2 %v1931_v48  ;;  %v1839_v29 = vor.u32 %v2182_v36, %v1838_v35  ;;  %v2176_v48 = vld [vmem:[#allocation5 + $0x28c] sm:$0xf]  ;;  %v1935_v14 = vor.u32 %v2206_v12, %v1934_v11  ;;  %v1939_v18 = vor.u32 %v2204_v13, %v1936_v15  ;;  %v1760_v36 = vld [vmem:[#allocation5 + $0x218] sm:$0xf0]  ;;  %v2056_v15 = vld [vmem:[#allocation5 + $0xc8] sm:$0xf] }
 0x277   :  { %v1827_v51 = vor.u32 %v2176_v48, %v1824_v50  ;;  %v1923_v35 = vor.u32 %v2200_v25, %v1920_v26  ;;  %v2237_v11 = vld [vmem:[#allocation5 + $0xec] sm:$0xf]  ;;  %v2066_v13 = vld [vmem:[#allocation5 + $0xf8] sm:$0xf0]  ;;  %v2048_v26 = vld [vmem:[#allocation5 + $0xa8] sm:$0xf] }
 0x278   :  { %1192 = vmatpush.bf16.msra.mxu3 %v1839_v29  ;;  %v1759_v29 = vor.u32 %v2162_v27, %v1758_v32  ;;  %v2050_v27 = vld [vmem:[#allocation5 + $0xb8] sm:$0xf0] }
 0x27a   :  { %1169 = vmatpush.bf16.msra.mxu1 %v1787_v44  ;;  %1182 = vmatpush.bf16.msra.mxu2 %v1915_v60  ;;  %v2216_v44 = vld [vmem:[#allocation5 + $0x3cc] sm:$0xf]  ;;  %v1807_v60 = vor.u32 %v2174_v58, %v1806_v57  ;;  %v746_v58 = vld [vmem:[#allocation7] sm:$0x3f] }
 0x27b   :  { %v1987_v46 = vor.u32 %v2216_v44, %v1984_v45  ;;  %v1907_v45 = vor.u32 %v2196_v41, %v1904_v42  ;;  %v2040_v41 = vld [vmem:[#allocation5 + $0x88] sm:$0xf]  ;;  %v2232_v42 = vld [vmem:[#allocation5 + $0x94] sm:$0xf0] }
 0x27c   :  { %1193 = vmatpush.bf16.msra.mxu3 %v1823_v47  ;;  %v2194_v47 = vld [vmem:[#allocation5 + $0x314] sm:$0xf0] }
 0x27d   :  { %v1887_v50 = vor.u32 %v2194_v47, %v1886_v33  ;;  %v2250_v33 = vld [vmem:[#allocation5 + $0x1b4] sm:$0xf0]  ;;  %v2249_v47 = vld [vmem:[#allocation5 + $0x1ac] sm:$0xf] }
 0x27e   :  { %1170 = vmatpush.bf16.msra.mxu1 %v1771_v55  ;;  %1183 = vmatpush.bf16.msra.mxu2 %v1899_v16  ;;  %v1967_v55 = vor.u32 %v2214_v53, %v1966_v52  ;;  %v1774_v16 = vld [vmem:[#allocation5 + $0x228] sm:$0xf]  ;;  %v1888_v52 = vld [vmem:[#allocation5 + $0x318] sm:$0xf0] }
 0x27f   :  { %v1775_v19 = vor.u32 %v2166_v17, %v1774_v16  ;;  %v2236_v16 = vld [vmem:[#allocation5 + $0xd4] sm:$0xf0]  ;;  %v2235_v17 = vld [vmem:[#allocation5 + $0xcc] sm:$0xf] }
 0x280   :  { %1205 = vmatpush.bf16.msrb.mxu0 %v1967_v55  ;;  %1194 = vmatpush.bf16.msra.mxu3 %v1807_v60 }
 0x282   :  { %1171 = vmatpush.bf16.msra.mxu1 %v1755_v3  ;;  %1184 = vmatpush.bf16.msra.mxu2 %v1883_v28  ;;  %v1952_v3 = vld [vmem:[#allocation5 + $0x398] sm:$0xf0] }
 0x283   :  { %v1955_v4 = vor.u32 %v2208_v2, %v1952_v3  ;;  %v747_v2 = vld [vmem:[#allocation7 + $0x8] sm:$0x3f] }
 0x284   :  { %1206 = vmatpush.bf16.msrb.mxu0 %v1951_v1 }
 0x286   :  { %1216 = vmatpush.bf16.msrb.mxu1 %v1875_v7  ;;  %1229 = vmatpush.bf16.msrb.mxu2 %v2003_v34  ;;  %v1791_v7 = vor.u32 %v2170_v6, %v1790_v5  ;;  %v2160_v34 = vld [vmem:[#allocation5 + $0x20c] sm:$0xf] }
 0x287   :  { %v1763_v38 = vor.u32 %v2160_v34, %v1760_v36  ;;  %v2252_v36 = vld [vmem:[#allocation5 + $0x1d4] sm:$0xf0] }
 0x288   :  { %1195 = vmatpush.bf16.msra.mxu3 %v1791_v7  ;;  %1207 = vmatpush.bf16.msrb.mxu0 %v1935_v14  ;;  %v2069_v14 = vor.u32 %v2237_v11, %v2066_v13  ;;  %v2016_v13 = vld [vmem:[#allocation5 + $0x28] sm:$0xf] }
 0x28a   :  { %1217 = vmatpush.bf16.msrb.mxu1 %v1859_v20  ;;  %1230 = vmatpush.bf16.msrb.mxu2 %v1987_v46  ;;  %v2164_v20 = vld [vmem:[#allocation5 + $0x22c] sm:$0xf] }
 0x28b   :  { %v1779_v23 = vor.u32 %v2164_v20, %v1776_v21  ;;  %v2128_v21 = vld [vmem:[#allocation5 + $0x1e8] sm:$0xf] }
 0x28c   :  { %1196 = vmatpush.bf16.msra.mxu3 %v1775_v19  ;;  %1208 = vmatpush.bf16.msrb.mxu0 %v1919_v31  ;;  %v2058_v19 = vld [vmem:[#allocation5 + $0xd8] sm:$0xf0]  ;;  %v2233_v31 = vld [vmem:[#allocation5 + $0xac] sm:$0xf] }
 0x28d   :  { %v2061_v20 = vor.u32 %v2235_v17, %v2058_v19  ;;  %v2053_v34 = vor.u32 %v2233_v31, %v2050_v27  ;;  %v2225_v17 = vld [vmem:[#allocation5 + $0x2c] sm:$0xf]  ;;  %v2088_v19 = vld [vmem:[#allocation5 + $0x148] sm:$0xf]  ;;  %v2010_v27 = vld [vmem:[#allocation5 + $0x18] sm:$0xf0] }
 0x28e   :  { %1218 = vmatpush.bf16.msrb.mxu1 %v1843_v30  ;;  %1231 = vmatpush.bf16.msrb.mxu2 %v1971_v40  ;;  %v2198_v30 = vld [vmem:[#allocation5 + $0x334] sm:$0xf0]  ;;  %v2223_v31 = vld [vmem:[#allocation5 + $0xc] sm:$0xf] }
 0x28f   :  { %v1903_v43 = vor.u32 %v2198_v30, %v1902_v37  ;;  %v2251_v37 = vld [vmem:[#allocation5 + $0x1cc] sm:$0xf] }
 0x290   :  { %1197 = vmatpush.bf16.msra.mxu3 %v1759_v29 }
 0x291   :  { %1209 = vmatpush.bf16.msrb.mxu0 %v1903_v43  ;;  %v2231_v43 = vld [vmem:[#allocation5 + $0x8c] sm:$0xf] }
 0x292   :  { %1219 = vmatpush.bf16.msrb.mxu1 %v1827_v51  ;;  %1232 = vmatpush.bf16.msrb.mxu2 %v1955_v4  ;;  %v2192_v51 = vld [vmem:[#allocation5 + $0x30c] sm:$0xf] }
 0x293   :  { %v1891_v53 = vor.u32 %v2192_v51, %v1888_v52  ;;  %v2032_v52 = vld [vmem:[#allocation5 + $0x68] sm:$0xf] }
 0x295   :  { %1210 = vmatpush.bf16.msrb.mxu0 %v1887_v50  ;;  %v2114_v50 = vld [vmem:[#allocation5 + $0x1b8] sm:$0xf0] }
 0x296   :  { %1220 = vmatpush.bf16.msrb.mxu1 %v1811_v62  ;;  %1233 = vmatpush.bf16.msrb.mxu2 %v1939_v18  ;;  %v2057_v18 = vor.u32 %v2236_v16, %v2056_v15  ;;  %v2117_v51 = vor.u32 %v2249_v47, %v2114_v50  ;;  %v2074_v47 = vld [vmem:[#allocation5 + $0x118] sm:$0xf0] }
 0x29a   :  { %1221 = vmatpush.bf16.msrb.mxu1 %v1795_v10  ;;  %1234 = vmatpush.bf16.msrb.mxu2 %v1923_v35  ;;  %v2238_v10 = vld [vmem:[#allocation5 + $0xf4] sm:$0xf0]  ;;  %v2120_v35 = vld [vmem:[#allocation5 + $0x1c8] sm:$0xf] }
 0x29b   :  { %v2065_v12 = vor.u32 %v2238_v10, %v2064_v9  ;;  %v2121_v29 = vor.u32 %v2252_v36, %v2120_v35  ;;  %v2242_v35 = vld [vmem:[#allocation5 + $0x134] sm:$0xf0]  ;;  %v2013_v36 = vor.u32 %v2223_v31, %v2010_v27  ;;  %v1544_v31 = vld [vmem:[#allocation7 + $0x130] sm:$0xff] }
 0x29c   :  { %v1542_v27 = vld [vmem:[#allocation7 + $0x110] sm:$0xff] }
 0x29e   :  { %1222 = vmatpush.bf16.msrb.mxu1 %v1779_v23  ;;  %1235 = vmatpush.bf16.msrb.mxu2 %v1907_v45  ;;  %v2129_v23 = vor.u32 %v2254_v22, %v2128_v21  ;;  %v2042_v45 = vld [vmem:[#allocation5 + $0x98] sm:$0xf0]  ;;  %v2244_v22 = vld [vmem:[#allocation5 + $0x154] sm:$0xf0] }
 0x2a2   :  { %1223 = vmatpush.bf16.msrb.mxu1 %v1763_v38  ;;  %1236 = vmatpush.bf16.msrb.mxu2 %v1891_v53  ;;  %v2122_v38 = vld [vmem:[#allocation5 + $0x1d8] sm:$0xf0]  ;;  %v2230_v53 = vld [vmem:[#allocation5 + $0x74] sm:$0xf0] }
 0x2a3   :  { %v2125_v30 = vor.u32 %v2251_v37, %v2122_v38  ;;  %v2241_v37 = vld [vmem:[#allocation5 + $0x12c] sm:$0xf] }
 0x2e1   :  { %v563_v8 = vpop.f32.mrf.mxu1 }
 0x2e2   :  { %v650_v28 = vpop.f32.mrf.mxu0 }
 0x2e3   :  { %v731_v62 = vrot.slane %v650_v28, 6  ;;  %v2234_v28 = vld [vmem:[#allocation5 + $0xb4] sm:$0xf0] }
 0x2e4   :  { %v2049_v32 = vor.u32 %v2234_v28, %v2048_v26  ;;  %v2008_v26 = vld [vmem:[#allocation5 + $0x8] sm:$0xf]  ;;  %v2224_v28 = vld [vmem:[#allocation5 + $0x14] sm:$0xf0] }
 0x2e7   :  { %v576_v44 = vpop.f32.mrf.mxu2 }
 0x2e8   :  { %v637_v46 = vpop.f32.mrf.mxu3  ;;  %v742_v3 = vsel %vm740_vm7, %v576_v44, %v731_v62  ;;  %v2041_v44 = vor.u32 %v2232_v42, %v2040_v41  ;;  %v2106_v62 = vld [vmem:[#allocation5 + $0x198] sm:$0xf0] }
 0x2e9   :  { %v565_v39 = vpop.f32.mrf.mxu1  ;;  %v730_v54 = vrot.slane %v637_v46, 6  ;;  %v2045_v46 = vor.u32 %v2231_v43, %v2042_v45  ;;  %v2072_v45 = vld [vmem:[#allocation5 + $0x108] sm:$0xf] }
 0x2ea   :  { %v652_v48 = vpop.f32.mrf.mxu0  ;;  %v2112_v39 = vld [vmem:[#allocation5 + $0x1a8] sm:$0xf] }
 0x2eb   :  { %v741_v59 = vsel %vm740_vm7, %v563_v8, %v730_v54  ;;  %v2253_v8 = vld [vmem:[#allocation5 + $0x1ec] sm:$0xf]  ;;  %v2113_v48 = vor.u32 %v2250_v33, %v2112_v39 }
 0x2ec   :  { %v2133_v25 = vor.u32 %v2253_v8, %v2130_v24  ;;  %v2229_v54 = vld [vmem:[#allocation5 + $0x6c] sm:$0xf]  ;;  %v2089_v24 = vor.u32 %v2244_v22, %v2088_v19  ;;  %v1551_v22 = vld [vmem:[#allocation7 + $0x1a0] sm:$0xff] }
 0x2ed   :  { %v2243_v8 = vld [vmem:[#allocation5 + $0x14c] sm:$0xf] }
 0x2ee   :  { %v2239_v39 = vld [vmem:[#allocation5 + $0x10c] sm:$0xf] }
 0x2ef   :  { %v578_v55 = vpop.f32.mrf.mxu2 }
 0x2f0   :  { %v639_v56 = vpop.f32.mrf.mxu3 }
 0x2f1   :  { %v711_v40 = vpop.f32.mrf.mxu1  ;;  %v2033_v56 = vor.u32 %v2230_v53, %v2032_v52  ;;  %v815_v53 = vld [vmem:[#allocation7 + $0x10] ss:$8 sm:$0x3] }
 0x2f2   :  { %v736_v57 = vrot.slane %v711_v40, 4  ;;  %v2034_v40 = vld [vmem:[#allocation5 + $0x78] sm:$0xf0] }
 0x2f4   :  { %v744_v60 = vsel %vm743_vm6, %v741_v59, %v736_v57  ;;  %v2037_v57 = vor.u32 %v2229_v54, %v2034_v40  ;;  %v2248_v59 = vld [vmem:[#allocation5 + $0x194] sm:$0xf0] }
 0x2f5   :  { %v748_v61 = vadd.f32 %v746_v58, %v744_v60  ;;  %v2104_v58 = vld [vmem:[#allocation5 + $0x188] sm:$0xf]  ;;  %v2247_v60 = vld [vmem:[#allocation5 + $0x18c] sm:$0xf] }
 0x2f7   :  { %v816_v63 = vpack.c.bf16 %v748_v61, %v748_v61  ;;  %v724_v0 = vpop.f32.mrf.mxu2  ;;  %v2105_v61 = vor.u32 %v2248_v59, %v2104_v58  ;;  %v1257_v59 = vperm.slane %v815_v53, 0 }
 0x2f8   :  { %v737_v1 = vrot.slane %v724_v0, 4  ;;  %v2024_v0 = vld [vmem:[#allocation5 + $0x48] sm:$0xf] }
 0x2f9   :  { %v713_v4 = vpop.f32.mrf.mxu1  ;;  %1146 = vmatmul.bf16.vlgmr.msrb.gmra.mxu3 %v816_v63  ;;  %1172 = vmatmul.bf16.vlgmr.msra.gmra.mxu1 %v816_v63 }
 0x2fa   :  { %v745_v5 = vsel %vm743_vm6, %v742_v3, %v737_v1  ;;  %1470 = vmatpush.bf16.msrb.mxu3 %v2065_v12  ;;  %1496 = vmatpush.bf16.msra.mxu1 %v2069_v14  ;;  %v2228_v1 = vld [vmem:[#allocation5 + $0x54] sm:$0xf0]  ;;  %v2026_v4 = vld [vmem:[#allocation5 + $0x58] sm:$0xf0] }
 0x2fb   :  { %v749_v6 = vadd.f32 %v747_v2, %v745_v5  ;;  %v2227_v2 = vld [vmem:[#allocation5 + $0x4c] sm:$0xf]  ;;  %v2025_v3 = vor.u32 %v2228_v1, %v2024_v0  ;;  %v2098_v12 = vld [vmem:[#allocation5 + $0x178] sm:$0xf0]  ;;  %v2226_v14 = vld [vmem:[#allocation5 + $0x34] sm:$0xf0] }
 0x2fc   :  { %v2029_v5 = vor.u32 %v2227_v2, %v2026_v4  ;;  %v2017_v16 = vor.u32 %v2226_v14, %v2016_v13 }
 0x2fd   :  { %v817_v49 = vpack.c.bf16 %v749_v6, %v749_v6  ;;  %v2096_v6 = vld [vmem:[#allocation5 + $0x168] sm:$0xf] }
 0x2fe   :  { %1471 = vmatpush.bf16.msrb.mxu3 %v2057_v18  ;;  %1497 = vmatpush.bf16.msra.mxu1 %v2061_v20  ;;  %v2018_v18 = vld [vmem:[#allocation5 + $0x38] sm:$0xf0] }
 0x2ff   :  { %v726_v7 = vpop.f32.mrf.mxu2  ;;  %1159 = vmatmul.bf16.vlgmr.msra.gmra.mxu0 %v817_v49  ;;  %1185 = vmatmul.bf16.vlgmr.msra.gmra.mxu2 %v817_v49  ;;  %v2021_v21 = vor.u32 %v2225_v17, %v2018_v18 }
 0x300   :  { %1483 = vmatpush.bf16.msra.mxu0 %v2129_v23  ;;  %1509 = vmatpush.bf16.msra.mxu2 %v2133_v25  ;;  %v2245_v7 = vld [vmem:[#allocation5 + $0x16c] sm:$0xf]  ;;  %v2090_v23 = vld [vmem:[#allocation5 + $0x158] sm:$0xf0] }
 0x301   :  { %v2101_v15 = vor.u32 %v2245_v7, %v2098_v12  ;;  %v2093_v25 = vor.u32 %v2243_v8, %v2090_v23  ;;  %v1550_v8 = vld [vmem:[#allocation7 + $0x190] sm:$0xff]  ;;  %v1549_v23 = vld [vmem:[#allocation7 + $0x180] sm:$0xff] }
 0x302   :  { %1472 = vmatpush.bf16.msrb.mxu3 %v2049_v32  ;;  %1498 = vmatpush.bf16.msra.mxu1 %v2053_v34  ;;  %v2009_v32 = vor.u32 %v2224_v28, %v2008_v26  ;;  %v2080_v34 = vld [vmem:[#allocation5 + $0x128] sm:$0xf]  ;;  %v1546_v26 = vld [vmem:[#allocation7 + $0x150] sm:$0xff]  ;;  %v1545_v28 = vld [vmem:[#allocation7 + $0x140] sm:$0xff] }
 0x304   :  { %1484 = vmatpush.bf16.msra.mxu0 %v2121_v29  ;;  %1510 = vmatpush.bf16.msra.mxu2 %v2125_v30  ;;  %v2082_v29 = vld [vmem:[#allocation5 + $0x138] sm:$0xf0]  ;;  %v2081_v30 = vor.u32 %v2242_v35, %v2080_v34  ;;  %v1541_v34 = vld [vmem:[#allocation7 + $0x100] sm:$0xff]  ;;  %v1540_v35 = vld [vmem:[#allocation7 + $0xf0] sm:$0xff] }
 0x305   :  { %v2085_v41 = vor.u32 %v2241_v37, %v2082_v29  ;;  %v1538_v37 = vld [vmem:[#allocation7 + $0xd0] sm:$0xff]  ;;  %v1537_v29 = vld [vmem:[#allocation7 + $0xc0] sm:$0xff] }
 0x306   :  { %1473 = vmatpush.bf16.msrb.mxu3 %v2041_v44  ;;  %1499 = vmatpush.bf16.msra.mxu1 %v2045_v46  ;;  %v2240_v46 = vld [vmem:[#allocation5 + $0x114] sm:$0xf0] }
 0x307   :  { %v2073_v33 = vor.u32 %v2240_v46, %v2072_v45 }
 0x308   :  { %1485 = vmatpush.bf16.msra.mxu0 %v2113_v48  ;;  %1511 = vmatpush.bf16.msra.mxu2 %v2117_v51  ;;  %v2077_v48 = vor.u32 %v2239_v39, %v2074_v47 }
 0x309   :  { %1198 = vmatmul.bf16.vlgmr.msra.gmra.mxu3 %v816_v63  ;;  %1224 = vmatmul.bf16.vlgmr.msrb.gmra.mxu1 %v816_v63  ;;  %v2109_v63 = vor.u32 %v2247_v60, %v2106_v62 }
 0x30a   :  { %1474 = vmatpush.bf16.msrb.mxu3 %v2033_v56  ;;  %1500 = vmatpush.bf16.msra.mxu1 %v2037_v57 }
 0x30c   :  { %1486 = vmatpush.bf16.msra.mxu0 %v2105_v61  ;;  %1512 = vmatpush.bf16.msra.mxu2 %v2109_v63 }
 0x30e   :  { %1475 = vmatpush.bf16.msrb.mxu3 %v2025_v3  ;;  %1501 = vmatpush.bf16.msra.mxu1 %v2029_v5 }
 0x30f   :  { %1211 = vmatmul.bf16.vlgmr.msrb.gmra.mxu0 %v817_v49  ;;  %1237 = vmatmul.bf16.vlgmr.msrb.gmra.mxu2 %v817_v49  ;;  %v2246_v49 = vld [vmem:[#allocation5 + $0x174] sm:$0xf0] }
 0x310   :  { %v2097_v11 = vor.u32 %v2246_v49, %v2096_v6  ;;  %1513 = vmatpush.bf16.msra.mxu2 %v2101_v15  ;;  %v1258_v49 = vperm.slane %v815_v53, 1 }
 0x312   :  { %1487 = vmatpush.bf16.msra.mxu0 %v2097_v11  ;;  %1476 = vmatpush.bf16.msrb.mxu3 %v2017_v16 }
 0x313   :  { %1502 = vmatpush.bf16.msra.mxu1 %v2021_v21 }
 0x314   :  { %1514 = vmatpush.bf16.msra.mxu2 %v2093_v25  ;;  %v1547_v25 = vld [vmem:[#allocation7 + $0x160] sm:$0xff] }
 0x316   :  { %1488 = vmatpush.bf16.msra.mxu0 %v2089_v24  ;;  %1477 = vmatpush.bf16.msrb.mxu3 %v2009_v32  ;;  %v1548_v24 = vld [vmem:[#allocation7 + $0x170] sm:$0xff]  ;;  %v1543_v32 = vld [vmem:[#allocation7 + $0x120] sm:$0xff] }
 0x317   :  { %1503 = vmatpush.bf16.msra.mxu1 %v2013_v36  ;;  %v1539_v36 = vld [vmem:[#allocation7 + $0xe0] sm:$0xff] }
 0x318   :  { %1515 = vmatpush.bf16.msra.mxu2 %v2085_v41 }
 0x31a   :  { %1489 = vmatpush.bf16.msra.mxu0 %v2081_v30  ;;  %1553 = vmatpush.msra.mxu3 %v1551_v22  ;;  %v1536_v30 = vld [vmem:[#allocation7 + $0xb0] sm:$0xff] }
 0x31c   :  { %1516 = vmatpush.bf16.msra.mxu2 %v2077_v48  ;;  %1554 = vmatpush.msra.mxu3 %v1550_v8 }
 0x31e   :  { %1490 = vmatpush.bf16.msra.mxu0 %v2073_v33  ;;  %1555 = vmatpush.msra.mxu3 %v1549_v23 }
 0x320   :  { %1556 = vmatpush.msra.mxu3 %v1548_v24 }
 0x322   :  { %1557 = vmatpush.msra.mxu3 %v1547_v25 }
 0x324   :  { %1558 = vmatpush.msra.mxu3 %v1546_v26 }
 0x326   :  { %1559 = vmatpush.msra.mxu3 %v1545_v28 }
 0x328   :  { %1560 = vmatpush.msra.mxu3 %v1544_v31 }
 0x32a   :  { %1561 = vmatpush.msra.mxu3 %v1543_v32 }
 0x32c   :  { %1562 = vmatpush.msra.mxu3 %v1542_v27 }
 0x32e   :  { %1563 = vmatpush.msra.mxu3 %v1541_v34 }
 0x330   :  { %1564 = vmatpush.msra.mxu3 %v1540_v35 }
 0x332   :  { %1565 = vmatpush.msra.mxu3 %v1539_v36 }
 0x334   :  { %1566 = vmatpush.msra.mxu3 %v1538_v37 }
 0x336   :  { %1567 = vmatpush.msra.mxu3 %v1537_v29 }
 0x338   :  { %1568 = vmatpush.msra.mxu3 %v1536_v30 }
 0x376   :  { %v2488_v55 = vpop.f32.mrf.mxu1 }
 0x37c   :  { %v1147_v9 = vpop.f32.mrf.mxu3  ;;  %v1160_v10 = vpop.f32.mrf.mxu0 }
 0x37d   :  { %v1161_v58 = vadd.f32 %v1160_v10, %v1147_v9 }
 0x37e   :  { %v1175_v20 = vpop.f32.mrf.mxu1 }
 0x382   :  { %v1186_v38 = vpop.f32.mrf.mxu2 }
 0x383   :  { %v1187_v5 = vadd.f32 %v1186_v38, %v2488_v55 }
 0x384   :  { %v1149_v42 = vpop.f32.mrf.mxu3  ;;  %v1162_v43 = vpop.f32.mrf.mxu0 }
 0x386   :  { %v1225_v44 = vpop.f32.mrf.mxu1 }
 0x38a   :  { %v1188_v50 = vpop.f32.mrf.mxu2 }
 0x38c   :  { %v1199_v51 = vpop.f32.mrf.mxu3  ;;  %v1212_v52 = vpop.f32.mrf.mxu0 }
 0x38d   :  { %v1213_v54 = vadd.f32 %v1212_v52, %v1199_v51  ;;  %v1307_v51 = vld [vmem:[#allocation7 + $0x20] ss:$0 sm:$0xff] }
 0x38e   :  { %v1227_v56 = vpop.f32.mrf.mxu1 }
 0x38f   :  { %v1244_v40 = vrot.slane %v1213_v54, 4  ;;  %v1248_v57 = vrot.slane %v1213_v54, 6 }
 0x391   :  { %v1252_v60 = vsel %vm740_vm7, %v1244_v40, %v1248_v57 }
 0x392   :  { %v1254_v61 = vadd.f32 %v1252_v60, %v1161_v58  ;;  %v1238_v62 = vpop.f32.mrf.mxu2 }
 0x393   :  { %v1239_v63 = vadd.f32 %v1238_v62, %v1225_v44 }
 0x394   :  { %v1261_v0 = vadd.f32 %v1257_v59, %v1254_v61  ;;  %v1201_v1 = vpop.f32.mrf.mxu3  ;;  %v1214_v2 = vpop.f32.mrf.mxu0 }
 0x395   :  { %v1245_v3 = vrot.slane %v1239_v63, 4  ;;  %v1249_v4 = vrot.slane %v1239_v63, 6 }
 0x396   :  { %v1265_v6 = vmin.f32 %v1261_v0, 0.0  ;;  %vm1263_vm8 = vcmp.gt.f32.partialorder %v1261_v0, 0.0 }
 0x397   :  { %v1253_v7 = vsel %vm740_vm7, %v1245_v3, %v1249_v4 }
 0x398   :  { %v1255_v11 = vadd.f32 %v1253_v7, %v1187_v5  ;;  %v1267_v12 = vmul.f32 1.442695, %v1265_v6 }
 0x39a   :  { %v1262_v9 = vadd.f32 %v1258_v49, %v1255_v11  ;;  %v1240_v10 = vpop.f32.mrf.mxu2  ;;  %2269 = vpow2.f32 %v1267_v12 }
 0x39c   :  { %v1266_v13 = vmin.f32 %v1262_v9, 0.0  ;;  %vm1264_vm9 = vcmp.gt.f32.partialorder %v1262_v9, 0.0 }
 0x39e   :  { %v1269_v14 = vmul.f32 1.442695, %v1266_v13 }
 0x3a0   :  { %v2270_v15 = vpop.eup %2269  ;;  %2271 = vpow2.f32 %v1269_v14 }
 0x3a1   :  { %v2004_v16 = vadd.f32 -1.0, %v2270_v15 }
 0x3a3   :  { %v1273_v17 = vsel %vm1263_vm8, %v1261_v0, %v2004_v16  ;;  %v1552_v0 = vld [vmem:[#allocation7 + $0x30] ss:$0 sm:$0xff] }
 0x3a4   :  { %v1308_v18 = vpack.c.bf16 %v1273_v17, %v1273_v17 }
 0x3a6   :  { %v2272_v19 = vpop.eup %2271  ;;  %1478 = vmatmul.bf16.vlgmr.msrb.gmra.mxu3 %v1308_v18  ;;  %1504 = vmatmul.bf16.vlgmr.msra.gmra.mxu1 %v1308_v18 }
 0x3a7   :  { %v2005_v55 = vadd.f32 -1.0, %v2272_v19 }
 0x3a9   :  { %v1274_v20 = vsel %vm1264_vm9, %v1262_v9, %v2005_v55 }
 0x3aa   :  { %v1309_v21 = vpack.c.bf16 %v1274_v20, %v1274_v20 }
 0x3ac   :  { %1491 = vmatmul.bf16.vlgmr.msra.gmra.mxu0 %v1309_v21  ;;  %1517 = vmatmul.bf16.vlgmr.msra.gmra.mxu2 %v1309_v21 }
 0x423   :  { %v1505_v38 = vpop.f32.mrf.mxu1 }
 0x429   :  { %v1479_v41 = vpop.f32.mrf.mxu3  ;;  %v1492_v42 = vpop.f32.mrf.mxu0 }
 0x42a   :  { %v1493_v48 = vadd.f32 %v1492_v42, %v1479_v41 }
 0x42b   :  { %v1507_v43 = vpop.f32.mrf.mxu1 }
 0x42f   :  { %v1518_v44 = vpop.f32.mrf.mxu2 }
 0x430   :  { %v1519_v45 = vadd.f32 %v1518_v44, %v1505_v38 }
 0x431   :  { %v1481_v46 = vpop.f32.mrf.mxu3  ;;  %v1494_v39 = vpop.f32.mrf.mxu0 }
 0x432   :  { %v1523_v33 = vrot.slane %v1519_v45, 4  ;;  %v1525_v47 = vrot.slane %v1519_v45, 6 }
 0x434   :  { %v1527_v50 = vsel %vm740_vm7, %v1523_v33, %v1525_v47 }
 0x435   :  { %v1528_v52 = vadd.f32 %v1527_v50, %v1493_v48 }
 0x437   :  { %v1520_v53 = vpop.f32.mrf.mxu2  ;;  %v1529_v54 = vadd.f32 %v1528_v52, %v1307_v51 }
 0x439   :  { %v1531_v56 = vmin.f32 %v1529_v54, 0.0  ;;  %vm1530_vm10 = vcmp.gt.f32.partialorder %v1529_v54, 0.0 }
 0x43b   :  { %v1532_v40 = vmul.f32 1.442695, %v1531_v56 }
 0x43d   :  { %2273 = vpow2.f32 %v1532_v40 }
 0x443   :  { %v2274_v57 = vpop.eup %2273 }
 0x444   :  { %v2134_v58 = vadd.f32 -1.0, %v2274_v57 }
 0x446   :  { %v1535_v59 = vsel %vm1530_vm10, %v1529_v54, %v2134_v58 }
 0x447   :  { %1569 = vmatmul.f32.vlgmr.msra.gmra.mxu3 %v1535_v59 }
 0x4ca   :  { %v1570_v60 = vpop.f32.mrf.mxu3 }
 0x4cb   :  { %v1574_v61 = vrot.slane %v1570_v60, 4  ;;  %v1576_v62 = vrot.slane %v1570_v60, 6 }
 0x4cd   :  { %v1578_v63 = vsel %vm740_vm7, %v1574_v61, %v1576_v62 }
 0x4ce   :  { %1580 = vrot.lane.b32.xlu0 %v1578_v63, %s2384_s0 }
 0x540   :  { %v1581_v1 = vpop.permute.xlu0 %1580 }
 0x541   :  { %v1583_v2 = vadd.f32 %v1581_v1, %v1570_v60 }
 0x543   :  { %v1584_v3 = vadd.f32 %v1583_v2, %v1552_v0 }
 0x545   :  { %1586 = vst.msk [vmem:[#allocation8] sm:$0x3f] %vm1585_vm11, %v1584_v3 }
 0x546   :  { %1597 = dma.vmem_to_hbm [thread:$0]  %s1593_s28, 128, %s1595_s4, [#allocation4]  }
 0x547   :  { %2375 = dma.done.wait [#allocation4], 128  }
 0x548   :  { %2376 = vsyncadd [#allocation4], 4294967168 }
 0x549   :  { %1602 = vsyncpa [#allocation3], 1 }
 0x54a   :  { %1603 = vsyncpa [#allocation6], 1 }
 0x54b   :  { %1604 = vsyncpa [#allocation4], 1 }

</bundles_post_ra>
